<compile_context>
chip_gen: v7x
topology: tpu7x:2x2x1
jax: 0.10.0
libtpu: 0.0.40
codegen_flags: <defaults>
</compile_context>

<pallas_src>
import jax
import jax.numpy as jnp
from jax.experimental import pallas as pl
from jax.experimental.pallas import tpu as pltpu

HIDDEN = 512
OUT = 2
OUT_PAD = 128                 # lane-dense padded output width
LANE = 128
TB_MAX = 256                  # batch tile (MXU M dimension)
TK_MAX = 2048                 # K tile over flattened features (bounds w1 VMEM)
VMEM_LIMIT = 48 * 1024 * 1024  # <= v7x 64 MiB physical, well under v5e/v6e 128 MiB


def _round_up(x, m):
    return (x + m - 1) // m * m


def _mlp_kernel(x_ref, w1_ref, b1_ref, w2_ref, b2_ref, w3_ref, b3_ref,
                w4_ref, b4_ref, o_ref, acc_ref):
    k = pl.program_id(1)

    @pl.when(k == 0)
    def _():
        acc_ref[...] = jnp.zeros_like(acc_ref)

    # Layer 1 partial product for this K tile (bf16 inputs, f32 accumulate).
    acc_ref[...] += jnp.dot(x_ref[...], w1_ref[...],
                            preferred_element_type=jnp.float32)

    @pl.when(k == pl.num_programs(1) - 1)
    def _():
        # Layer 1 bias + ReLU
        h = jnp.maximum(acc_ref[...] + b1_ref[...], 0.0).astype(jnp.bfloat16)
        # Layer 2: Linear(512, 512) + ReLU
        h = jnp.dot(h, w2_ref[...], preferred_element_type=jnp.float32)
        h = jnp.maximum(h + b2_ref[...], 0.0).astype(jnp.bfloat16)
        # Layer 3: Linear(512, 512) + ReLU
        h = jnp.dot(h, w3_ref[...], preferred_element_type=jnp.float32)
        h = jnp.maximum(h + b3_ref[...], 0.0).astype(jnp.bfloat16)
        # Regression head: Linear(512, OUT_PAD) (columns beyond OUT are zero)
        y = jnp.dot(h, w4_ref[...], preferred_element_type=jnp.float32)
        o_ref[...] = (y + b4_ref[...]).astype(o_ref.dtype)


@jax.jit
def dummy_model_forward(signals, params):
    """signals: any shape (B, ...); flattened to (B, F) like x.view(B, -1)."""
    B = signals.shape[0]
    x = signals.reshape(B, -1)
    F = x.shape[1]

    w1, b1, w2, b2, w3, b3, w4, b4 = params
    assert w1.shape == (F, HIDDEN)

    # --- K tiling over the flattened feature dim (layer-1 contraction) ---
    F_pad = _round_up(F, LANE)
    if F_pad <= TK_MAX:
        TK = F_pad
    else:
        TK = TK_MAX
        F_pad = _round_up(F_pad, TK)   # zero-padded rows of w1 contribute 0
    n_k = F_pad // TK

    # --- batch tiling: big tiles, but keep >= 2 tiles when B is large so the
    #     "parallel" axis splits across both v7x TensorCores ---
    B_pad = _round_up(max(B, 1), 8)
    if B_pad <= TB_MAX:
        TB = B_pad                      # small batch: one tile
    else:
        TB = TB_MAX
        B_pad = _round_up(B_pad, TB)
    n_b = B_pad // TB

    # --- cast to bf16 BEFORE padding; single fused pad (one HBM pass) ---
    x_bf = jnp.pad(x.astype(jnp.bfloat16), ((0, B_pad - B), (0, F_pad - F)))
    w1_bf = jnp.pad(w1.astype(jnp.bfloat16), ((0, F_pad - F), (0, 0)))
    w2_bf = w2.astype(jnp.bfloat16)
    w3_bf = w3.astype(jnp.bfloat16)
    # pad the head 2 -> 128 output lanes (lane-dense, unmasked store)
    w4_bf = jnp.pad(w4, ((0, 0), (0, OUT_PAD - OUT))).astype(jnp.bfloat16)
    b4p = jnp.pad(b4, ((0, 0), (0, OUT_PAD - OUT)))

    resident = lambda i, k: (0, 0)      # same block for every grid point
    single = pl.Buffered(1)             # constant block: no 2nd VMEM buffer

    flops = 2 * B_pad * (F_pad * HIDDEN + 2 * HIDDEN * HIDDEN
                         + HIDDEN * OUT_PAD)
    bytes_accessed = (
        x_bf.size * 2
        + (w1_bf.size + w2_bf.size + w3_bf.size + w4_bf.size) * 2
        + (b1.size + b2.size + b3.size + b4p.size) * 4
        + B_pad * OUT_PAD * 4
    )

    out = pl.pallas_call(
        _mlp_kernel,
        out_shape=jax.ShapeDtypeStruct((B_pad, OUT_PAD), jnp.float32),
        grid=(n_b, n_k),
        in_specs=[
            pl.BlockSpec((TB, TK), lambda i, k: (i, k)),                      # x
            pl.BlockSpec((TK, HIDDEN), lambda i, k: (k, 0)),                  # w1
            pl.BlockSpec((1, HIDDEN), resident, pipeline_mode=single),        # b1
            pl.BlockSpec((HIDDEN, HIDDEN), resident, pipeline_mode=single),   # w2
            pl.BlockSpec((1, HIDDEN), resident, pipeline_mode=single),        # b2
            pl.BlockSpec((HIDDEN, HIDDEN), resident, pipeline_mode=single),   # w3
            pl.BlockSpec((1, HIDDEN), resident, pipeline_mode=single),        # b3
            pl.BlockSpec((HIDDEN, OUT_PAD), resident, pipeline_mode=single),  # w4
            pl.BlockSpec((1, OUT_PAD), resident, pipeline_mode=single),       # b4
        ],
        out_specs=pl.BlockSpec((TB, OUT_PAD), lambda i, k: (i, 0)),
        scratch_shapes=[pltpu.VMEM((TB, HIDDEN), jnp.float32)],
        compiler_params=pltpu.CompilerParams(
            dimension_semantics=("parallel", "arbitrary"),
            vmem_limit_bytes=VMEM_LIMIT,
        ),
        cost_estimate=pl.CostEstimate(
            flops=flops, transcendentals=0, bytes_accessed=bytes_accessed),
    )(x_bf, w1_bf, b1, w2_bf, b2, w3_bf, b3, w4_bf, b4p)

    # strip batch padding and the padded output lanes
    return out[:B, :OUT]


def init_params(key, in_features):
    """Deterministic init mimicking PyTorch Linear default (uniform +/- 1/sqrt(fan_in)).
    Weights stored transposed: (in_features, out_features)."""
    def linear(key, fan_in, fan_out):
        kw, kb = jax.random.split(key)
        bound = 1.0 / jnp.sqrt(jnp.float32(fan_in))
        w = jax.random.uniform(kw, (fan_in, fan_out), jnp.float32, -bound, bound)
        b = jax.random.uniform(kb, (1, fan_out), jnp.float32, -bound, bound)
        return w, b

    k1, k2, k3, k4 = jax.random.split(key, 4)
    w1, b1 = linear(k1, in_features, HIDDEN)
    w2, b2 = linear(k2, HIDDEN, HIDDEN)
    w3, b3 = linear(k3, HIDDEN, HIDDEN)
    w4, b4 = linear(k4, HIDDEN, OUT)
    return (w1, b1, w2, b2, w3, b3, w4, b4)


def reference_forward(signals, params):
    """Pure-JAX f32 reference for correctness check."""
    B = signals.shape[0]
    x = signals.reshape(B, -1).astype(jnp.float32)
    w1, b1, w2, b2, w3, b3, w4, b4 = params
    h = jnp.maximum(x @ w1 + b1, 0.0)
    h = jnp.maximum(h @ w2 + b2, 0.0)
    h = jnp.maximum(h @ w3 + b3, 0.0)
    return h @ w4 + b4


if __name__ == "__main__":
    key = jax.random.PRNGKey(0)
    k_sig, k_par = jax.random.split(key)

    # small example input consistent with the forward: dict {'signals': (B, C, H, W)}
    B, C, H, W = 2, 4, 16, 16
    signals = jax.random.normal(k_sig, (B, C, H, W), jnp.float32)
    x = {"signals": signals}

    params = init_params(k_par, C * H * W)

    out = dummy_model_forward(x["signals"], params)
    out = jax.block_until_ready(out)

    ref = reference_forward(x["signals"], params)
    assert out.shape == (B, OUT)
    # bf16 matmul inputs with f32 accumulation -> loosened tolerance vs f32 ref
    assert jnp.allclose(out, ref, atol=2e-2, rtol=2e-2), (
        jnp.max(jnp.abs(out - ref)))

    print("KERNEL_OK")
</pallas_src>

<mosaic_0001>
module attributes {stable_mosaic.version = 11 : i64} {
  func.func @_mlp_kernel(%arg0: i32, %arg1: i32, %arg2: memref<8x1024xbf16, #tpu.memory_space<vmem>>, %arg3: memref<1024x512xbf16, #tpu.memory_space<vmem>>, %arg4: memref<1x512xf32, #tpu.memory_space<vmem>>, %arg5: memref<512x512xbf16, #tpu.memory_space<vmem>>, %arg6: memref<1x512xf32, #tpu.memory_space<vmem>>, %arg7: memref<512x512xbf16, #tpu.memory_space<vmem>>, %arg8: memref<1x512xf32, #tpu.memory_space<vmem>>, %arg9: memref<512x128xbf16, #tpu.memory_space<vmem>>, %arg10: memref<1x128xf32, #tpu.memory_space<vmem>>, %arg11: memref<8x128xf32, #tpu.memory_space<vmem>>, %arg12: memref<8x512xf32, #tpu.memory_space<vmem>>) attributes {dimension_semantics = [#tpu.dimension_semantics<parallel>, #tpu.dimension_semantics<arbitrary>], iteration_bounds = array<i64: 1, 1>, scalar_prefetch = 0 : i64, scratch_operands = 1 : i64, tpu.core_type = #tpu.core_type<tc>, window_params = [{transform_indices = @transform_0, window_bounds = array<i64: 8, 1024>}, {transform_indices = @transform_1, window_bounds = array<i64: 1024, 512>}, {pipeline_mode = #tpu.pipeline_mode<synchronous>, transform_indices = @transform_2, window_bounds = array<i64: 1, 512>}, {pipeline_mode = #tpu.pipeline_mode<synchronous>, transform_indices = @transform_3, window_bounds = array<i64: 512, 512>}, {pipeline_mode = #tpu.pipeline_mode<synchronous>, transform_indices = @transform_4, window_bounds = array<i64: 1, 512>}, {pipeline_mode = #tpu.pipeline_mode<synchronous>, transform_indices = @transform_5, window_bounds = array<i64: 512, 512>}, {pipeline_mode = #tpu.pipeline_mode<synchronous>, transform_indices = @transform_6, window_bounds = array<i64: 1, 512>}, {pipeline_mode = #tpu.pipeline_mode<synchronous>, transform_indices = @transform_7, window_bounds = array<i64: 512, 128>}, {pipeline_mode = #tpu.pipeline_mode<synchronous>, transform_indices = @transform_8, window_bounds = array<i64: 1, 128>}, {transform_indices = @transform_9, window_bounds = array<i64: 8, 128>}]} {
    %c0_i32 = arith.constant 0 : i32
    %0 = arith.cmpi eq, %arg1, %c0_i32 : i32
    %1 = arith.extui %0 : i1 to i32
    %c0_i32_0 = arith.constant 0 : i32
    %2 = arith.cmpi ne, %1, %c0_i32_0 : i32
    scf.if %2 {
      %cst_10 = arith.constant 0.000000e+00 : f32
      %12 = vector.broadcast %cst_10 : f32 to vector<8x512xf32>
      %c0_11 = arith.constant 0 : index
      %c0_12 = arith.constant 0 : index
      %13 = vector.load %arg12[%c0_11, %c0_12] : memref<8x512xf32, #tpu.memory_space<vmem>>, vector<8x512xf32>
      tpu.vector_store %arg12[%c0_11, %c0_12], %12 {strides = array<i32>} : memref<8x512xf32, #tpu.memory_space<vmem>>, vector<8x512xf32>,
    } else {
    }
    %c0 = arith.constant 0 : index
    %c0_1 = arith.constant 0 : index
    %3 = vector.load %arg12[%c0, %c0_1] : memref<8x512xf32, #tpu.memory_space<vmem>>, vector<8x512xf32>
    %c0_2 = arith.constant 0 : index
    %c0_3 = arith.constant 0 : index
    %4 = vector.load %arg2[%c0_2, %c0_3] : memref<8x1024xbf16, #tpu.memory_space<vmem>>, vector<8x1024xbf16>
    %c0_4 = arith.constant 0 : index
    %c0_5 = arith.constant 0 : index
    %5 = vector.load %arg3[%c0_4, %c0_5] : memref<1024x512xbf16, #tpu.memory_space<vmem>>, vector<1024x512xbf16>
    %cst = arith.constant dense<0.000000e+00> : vector<8x512xf32>
    %6 = tpu.matmul %4, %5, %cst {dimension_numbers = #tpu.dot_dimension_numbers<[1], [0], [0], [1], [0, 0, 1, 1], [], []>} : vector<8x1024xbf16>, vector<1024x512xbf16>, vector<8x512xf32> -> vector<8x512xf32>
    %7 = arith.addf %3, %6 : vector<8x512xf32>
    %c0_6 = arith.constant 0 : index
    %c0_7 = arith.constant 0 : index
    %8 = vector.load %arg12[%c0_6, %c0_7] : memref<8x512xf32, #tpu.memory_space<vmem>>, vector<8x512xf32>
    tpu.vector_store %arg12[%c0_6, %c0_7], %7 {strides = array<i32>} : memref<8x512xf32, #tpu.memory_space<vmem>>, vector<8x512xf32>,
    %c0_i32_8 = arith.constant 0 : i32
    %9 = arith.cmpi eq, %arg1, %c0_i32_8 : i32
    %10 = arith.extui %9 : i1 to i32
    %c0_i32_9 = arith.constant 0 : i32
    %11 = arith.cmpi ne, %10, %c0_i32_9 : i32
    scf.if %11 {
      %c0_10 = arith.constant 0 : index
      %c0_11 = arith.constant 0 : index
      %12 = vector.load %arg12[%c0_10, %c0_11] : memref<8x512xf32, #tpu.memory_space<vmem>>, vector<8x512xf32>
      %c0_12 = arith.constant 0 : index
      %c0_13 = arith.constant 0 : index
      %13 = vector.load %arg4[%c0_12, %c0_13] : memref<1x512xf32, #tpu.memory_space<vmem>>, vector<1x512xf32>
      %14 = vector.broadcast %13 : vector<1x512xf32> to vector<8x512xf32>
      %15 = arith.addf %12, %14 : vector<8x512xf32>
      %cst_14 = arith.constant 0.000000e+00 : f32
      %16 = vector.broadcast %cst_14 : f32 to vector<8x512xf32>
      %17 = arith.maximumf %15, %16 : vector<8x512xf32>
      %18 = arith.truncf %17 : vector<8x512xf32> to vector<8x512xbf16>
      %c0_15 = arith.constant 0 : index
      %c0_16 = arith.constant 0 : index
      %19 = vector.load %arg5[%c0_15, %c0_16] : memref<512x512xbf16, #tpu.memory_space<vmem>>, vector<512x512xbf16>
      %cst_17 = arith.constant dense<0.000000e+00> : vector<8x512xf32>
      %20 = tpu.matmul %18, %19, %cst_17 {dimension_numbers = #tpu.dot_dimension_numbers<[1], [0], [0], [1], [0, 0, 1, 1], [], []>} : vector<8x512xbf16>, vector<512x512xbf16>, vector<8x512xf32> -> vector<8x512xf32>
      %c0_18 = arith.constant 0 : index
      %c0_19 = arith.constant 0 : index
      %21 = vector.load %arg6[%c0_18, %c0_19] : memref<1x512xf32, #tpu.memory_space<vmem>>, vector<1x512xf32>
      %22 = vector.broadcast %21 : vector<1x512xf32> to vector<8x512xf32>
      %23 = arith.addf %20, %22 : vector<8x512xf32>
      %cst_20 = arith.constant 0.000000e+00 : f32
      %24 = vector.broadcast %cst_20 : f32 to vector<8x512xf32>
      %25 = arith.maximumf %23, %24 : vector<8x512xf32>
      %26 = arith.truncf %25 : vector<8x512xf32> to vector<8x512xbf16>
      %c0_21 = arith.constant 0 : index
      %c0_22 = arith.constant 0 : index
      %27 = vector.load %arg7[%c0_21, %c0_22] : memref<512x512xbf16, #tpu.memory_space<vmem>>, vector<512x512xbf16>
      %cst_23 = arith.constant dense<0.000000e+00> : vector<8x512xf32>
      %28 = tpu.matmul %26, %27, %cst_23 {dimension_numbers = #tpu.dot_dimension_numbers<[1], [0], [0], [1], [0, 0, 1, 1], [], []>} : vector<8x512xbf16>, vector<512x512xbf16>, vector<8x512xf32> -> vector<8x512xf32>
      %c0_24 = arith.constant 0 : index
      %c0_25 = arith.constant 0 : index
      %29 = vector.load %arg8[%c0_24, %c0_25] : memref<1x512xf32, #tpu.memory_space<vmem>>, vector<1x512xf32>
      %30 = vector.broadcast %29 : vector<1x512xf32> to vector<8x512xf32>
      %31 = arith.addf %28, %30 : vector<8x512xf32>
      %cst_26 = arith.constant 0.000000e+00 : f32
      %32 = vector.broadcast %cst_26 : f32 to vector<8x512xf32>
      %33 = arith.maximumf %31, %32 : vector<8x512xf32>
      %34 = arith.truncf %33 : vector<8x512xf32> to vector<8x512xbf16>
      %c0_27 = arith.constant 0 : index
      %c0_28 = arith.constant 0 : index
      %35 = vector.load %arg9[%c0_27, %c0_28] : memref<512x128xbf16, #tpu.memory_space<vmem>>, vector<512x128xbf16>
      %cst_29 = arith.constant dense<0.000000e+00> : vector<8x128xf32>
      %36 = tpu.matmul %34, %35, %cst_29 {dimension_numbers = #tpu.dot_dimension_numbers<[1], [0], [0], [1], [0, 0, 1, 1], [], []>} : vector<8x512xbf16>, vector<512x128xbf16>, vector<8x128xf32> -> vector<8x128xf32>
      %c0_30 = arith.constant 0 : index
      %c0_31 = arith.constant 0 : index
      %37 = vector.load %arg10[%c0_30, %c0_31] : memref<1x128xf32, #tpu.memory_space<vmem>>, vector<1x128xf32>
      %38 = vector.broadcast %37 : vector<1x128xf32> to vector<8x128xf32>
      %39 = arith.addf %36, %38 : vector<8x128xf32>
      %c0_32 = arith.constant 0 : index
      %c0_33 = arith.constant 0 : index
      %40 = vector.load %arg11[%c0_32, %c0_33] : memref<8x128xf32, #tpu.memory_space<vmem>>, vector<8x128xf32>
      tpu.vector_store %arg11[%c0_32, %c0_33], %39 {strides = array<i32>} : memref<8x128xf32, #tpu.memory_space<vmem>>, vector<8x128xf32>,
    } else {
    }
    return
  }
  func.func @transform_0(%arg0: i32, %arg1: i32) -> (i32, i32) {
    %c0_i32 = arith.constant 0 : i32
    return %arg0, %arg1 : i32, i32
  }
  func.func @transform_1(%arg0: i32, %arg1: i32) -> (i32, i32) {
    %c0_i32 = arith.constant 0 : i32
    %c0_i32_0 = arith.constant 0 : i32
    return %arg1, %c0_i32 : i32, i32
  }
  func.func @transform_2(%arg0: i32, %arg1: i32) -> (i32, i32) {
    %c0_i32 = arith.constant 0 : i32
    %c0_i32_0 = arith.constant 0 : i32
    %c0_i32_1 = arith.constant 0 : i32
    return %c0_i32, %c0_i32_0 : i32, i32
  }
  func.func @transform_3(%arg0: i32, %arg1: i32) -> (i32, i32) {
    %c0_i32 = arith.constant 0 : i32
    %c0_i32_0 = arith.constant 0 : i32
    %c0_i32_1 = arith.constant 0 : i32
    return %c0_i32, %c0_i32_0 : i32, i32
  }
  func.func @transform_4(%arg0: i32, %arg1: i32) -> (i32, i32) {
    %c0_i32 = arith.constant 0 : i32
    %c0_i32_0 = arith.constant 0 : i32
    %c0_i32_1 = arith.constant 0 : i32
    return %c0_i32, %c0_i32_0 : i32, i32
  }
  func.func @transform_5(%arg0: i32, %arg1: i32) -> (i32, i32) {
    %c0_i32 = arith.constant 0 : i32
    %c0_i32_0 = arith.constant 0 : i32
    %c0_i32_1 = arith.constant 0 : i32
    return %c0_i32, %c0_i32_0 : i32, i32
  }
  func.func @transform_6(%arg0: i32, %arg1: i32) -> (i32, i32) {
    %c0_i32 = arith.constant 0 : i32
    %c0_i32_0 = arith.constant 0 : i32
    %c0_i32_1 = arith.constant 0 : i32
    return %c0_i32, %c0_i32_0 : i32, i32
  }
  func.func @transform_7(%arg0: i32, %arg1: i32) -> (i32, i32) {
    %c0_i32 = arith.constant 0 : i32
    %c0_i32_0 = arith.constant 0 : i32
    %c0_i32_1 = arith.constant 0 : i32
    return %c0_i32, %c0_i32_0 : i32, i32
  }
  func.func @transform_8(%arg0: i32, %arg1: i32) -> (i32, i32) {
    %c0_i32 = arith.constant 0 : i32
    %c0_i32_0 = arith.constant 0 : i32
    %c0_i32_1 = arith.constant 0 : i32
    return %c0_i32, %c0_i32_0 : i32, i32
  }
  func.func @transform_9(%arg0: i32, %arg1: i32) -> (i32, i32) {
    %c0_i32 = arith.constant 0 : i32
    %c0_i32_0 = arith.constant 0 : i32
    return %arg0, %c0_i32 : i32, i32
  }
}

</mosaic_0001>

<bundles_post_ra>
// kernel: dummy_model_forward.1
= control target key start
LH: loop header
LB: loop body
LE: loop exit
PB: predicated region body
PF: predicated region fallthrough
CT: control target
= control target key end

     0   :  { %s7491_s1 = inlined_call_operand.vmem [shape: bf16[1024,512], index: 1, kind: input, shape index: {}]   ;;  %s7492_s0 = inlined_call_operand.vmem [shape: bf16[8,1024], index: 0, kind: input, shape index: {}]   ;;  %s7493_s3 = inlined_call_operand.vmem [shape: bf16[512,512], index: 3, kind: input, shape index: {}]   ;;  %s7494_s2 = inlined_call_operand.vmem [shape: f32[1,512], index: 2, kind: input, shape index: {}]   ;;  %s7495_s5 = inlined_call_operand.vmem [shape: bf16[512,512], index: 5, kind: input, shape index: {}]   ;;  %s7496_s7 = inlined_call_operand.vmem [shape: bf16[512,128], index: 7, kind: input, shape index: {}]   ;;  %s7497_s4 = inlined_call_operand.vmem [shape: f32[1,512], index: 4, kind: input, shape index: {}]   ;;  %s7498_s6 = inlined_call_operand.vmem [shape: f32[1,512], index: 6, kind: input, shape index: {}]   ;;  %s7499_s8 = inlined_call_operand.vmem [shape: f32[1,128], index: 8, kind: input, shape index: {}]   ;;  %s7500_s9 = inlined_call_operand.vmem [shape: f32[8,128], index: 9, kind: output, shape index: {}]  }
   0x1   :  { %v4883_v0 = vld [vmem:[%s7491_s1 + $0x4] ss:$16 sps:$4 sm:$0xff]   ;;  %v4887_v2 = vld [vmem:[%s7491_s1] ss:$16 sps:$4 sm:$0xff]   ;;  %v46_v48 = vld [vmem:[%s7492_s0 + $0x8] sm:$0xff] }
   0x2   :  { %v4885_v1 = vld [vmem:[%s7491_s1 + $0x204] ss:$16 sps:$4 sm:$0xff]   ;;  %1613 = vmatprep.subr.bf16.mxu0 %v4883_v0  ;;  %v4888_v3 = vld [vmem:[%s7491_s1 + $0x200] ss:$16 sps:$4 sm:$0xff]   ;;  %v5893_v51 = vcombine.high %v46_v48, %v46_v48 }
   0x3   :  { %1654 = vmatprep.subr.bf16.mxu1 %v4885_v1  ;;  %v4889_v4 = vld [vmem:[%s7491_s1 + $0x24] ss:$16 sps:$4 sm:$0xff]   ;;  %1614 = vmatpush1.bf16.msra.mxu0 %v4887_v2  ;;  %v4893_v6 = vld [vmem:[%s7491_s1 + $0x20] ss:$16 sps:$4 sm:$0xff]  }
   0x4   :  { %1655 = vmatpush1.bf16.msra.mxu1 %v4888_v3  ;;  %v4891_v5 = vld [vmem:[%s7491_s1 + $0x224] ss:$16 sps:$4 sm:$0xff]   ;;  %1615 = vmatprep.subr.bf16.mxu0 %v4889_v4  ;;  %v4894_v7 = vld [vmem:[%s7491_s1 + $0x220] ss:$16 sps:$4 sm:$0xff]  }
   0x5   :  { %1656 = vmatprep.subr.bf16.mxu1 %v4891_v5  ;;  %v4895_v8 = vld [vmem:[%s7491_s1 + $0x44] ss:$16 sps:$4 sm:$0xff]   ;;  %v4899_v10 = vld [vmem:[%s7491_s1 + $0x40] ss:$16 sps:$4 sm:$0xff]   ;;  %1686 = vmatprep.mubr.bf16.mxu1 %v5893_v51 }
   0x6   :  { %v4897_v9 = vld [vmem:[%s7491_s1 + $0x244] ss:$16 sps:$4 sm:$0xff]   ;;  %v4900_v11 = vld [vmem:[%s7491_s1 + $0x240] ss:$16 sps:$4 sm:$0xff]  }
   0x7   :  { %1616 = vmatpush1.bf16.msra.mxu0 %v4893_v6  ;;  %v4901_v12 = vld [vmem:[%s7491_s1 + $0x64] ss:$16 sps:$4 sm:$0xff]   ;;  %v4905_v14 = vld [vmem:[%s7491_s1 + $0x60] ss:$16 sps:$4 sm:$0xff]  }
   0x8   :  { %1657 = vmatpush1.bf16.msra.mxu1 %v4894_v7  ;;  %1617 = vmatprep.subr.bf16.mxu0 %v4895_v8  ;;  %v4903_v13 = vld [vmem:[%s7491_s1 + $0x264] ss:$16 sps:$4 sm:$0xff]   ;;  %v4906_v15 = vld [vmem:[%s7491_s1 + $0x260] ss:$16 sps:$4 sm:$0xff]   ;;  %v5953_v7 = vcombine.low %v46_v48, %v46_v48 }
   0x9   :  { %1658 = vmatprep.subr.bf16.mxu1 %v4897_v9  ;;  %v4907_v16 = vld [vmem:[%s7491_s1 + $0x84] ss:$16 sps:$4 sm:$0xff]   ;;  %v4911_v18 = vld [vmem:[%s7491_s1 + $0x80] ss:$16 sps:$4 sm:$0xff]  }
   0xa   :  { %v4909_v17 = vld [vmem:[%s7491_s1 + $0x284] ss:$16 sps:$4 sm:$0xff]   ;;  %v4912_v19 = vld [vmem:[%s7491_s1 + $0x280] ss:$16 sps:$4 sm:$0xff]  }
   0xb   :  { %1618 = vmatpush1.bf16.msra.mxu0 %v4899_v10  ;;  %v4913_v20 = vld [vmem:[%s7491_s1 + $0xa4] ss:$16 sps:$4 sm:$0xff]   ;;  %v4917_v22 = vld [vmem:[%s7491_s1 + $0xa0] ss:$16 sps:$4 sm:$0xff]  }
   0xc   :  { %1659 = vmatpush1.bf16.msra.mxu1 %v4900_v11  ;;  %1619 = vmatprep.subr.bf16.mxu0 %v4901_v12  ;;  %v4915_v21 = vld [vmem:[%s7491_s1 + $0x2a4] ss:$16 sps:$4 sm:$0xff]   ;;  %v4918_v23 = vld [vmem:[%s7491_s1 + $0x2a0] ss:$16 sps:$4 sm:$0xff]  }
   0xd   :  { %1660 = vmatprep.subr.bf16.mxu1 %v4903_v13  ;;  %v4919_v24 = vld [vmem:[%s7491_s1 + $0xc4] ss:$16 sps:$4 sm:$0xff]   ;;  %v4923_v26 = vld [vmem:[%s7491_s1 + $0xc0] ss:$16 sps:$4 sm:$0xff]  }
   0xe   :  { %v4921_v25 = vld [vmem:[%s7491_s1 + $0x2c4] ss:$16 sps:$4 sm:$0xff]   ;;  %v4924_v27 = vld [vmem:[%s7491_s1 + $0x2c0] ss:$16 sps:$4 sm:$0xff]  }
   0xf   :  { %1620 = vmatpush1.bf16.msra.mxu0 %v4905_v14  ;;  %v4925_v28 = vld [vmem:[%s7491_s1 + $0xe4] ss:$16 sps:$4 sm:$0xff]   ;;  %v4929_v30 = vld [vmem:[%s7491_s1 + $0xe0] ss:$16 sps:$4 sm:$0xff]  }
  0x10   :  { %1661 = vmatpush1.bf16.msra.mxu1 %v4906_v15  ;;  %1621 = vmatprep.subr.bf16.mxu0 %v4907_v16  ;;  %v4927_v29 = vld [vmem:[%s7491_s1 + $0x2e4] ss:$16 sps:$4 sm:$0xff]   ;;  %v4930_v31 = vld [vmem:[%s7491_s1 + $0x2e0] ss:$16 sps:$4 sm:$0xff]  }
  0x11   :  { %1662 = vmatprep.subr.bf16.mxu1 %v4909_v17  ;;  %v4931_v32 = vld [vmem:[%s7491_s1 + $0x104] ss:$16 sps:$4 sm:$0xff]   ;;  %v4935_v34 = vld [vmem:[%s7491_s1 + $0x100] ss:$16 sps:$4 sm:$0xff]  }
  0x12   :  { %v4933_v33 = vld [vmem:[%s7491_s1 + $0x304] ss:$16 sps:$4 sm:$0xff]   ;;  %v4936_v35 = vld [vmem:[%s7491_s1 + $0x300] ss:$16 sps:$4 sm:$0xff]  }
  0x13   :  { %1622 = vmatpush1.bf16.msra.mxu0 %v4911_v18  ;;  %v4937_v36 = vld [vmem:[%s7491_s1 + $0x124] ss:$16 sps:$4 sm:$0xff]   ;;  %v4941_v38 = vld [vmem:[%s7491_s1 + $0x120] ss:$16 sps:$4 sm:$0xff]  }
  0x14   :  { %1663 = vmatpush1.bf16.msra.mxu1 %v4912_v19  ;;  %1623 = vmatprep.subr.bf16.mxu0 %v4913_v20  ;;  %v4939_v37 = vld [vmem:[%s7491_s1 + $0x324] ss:$16 sps:$4 sm:$0xff]   ;;  %v4942_v39 = vld [vmem:[%s7491_s1 + $0x320] ss:$16 sps:$4 sm:$0xff]  }
  0x15   :  { %1664 = vmatprep.subr.bf16.mxu1 %v4915_v21  ;;  %v4943_v40 = vld [vmem:[%s7491_s1 + $0x144] ss:$16 sps:$4 sm:$0xff]   ;;  %v4947_v42 = vld [vmem:[%s7491_s1 + $0x140] ss:$16 sps:$4 sm:$0xff]  }
  0x16   :  { %v4945_v41 = vld [vmem:[%s7491_s1 + $0x344] ss:$16 sps:$4 sm:$0xff]   ;;  %v4948_v43 = vld [vmem:[%s7491_s1 + $0x340] ss:$16 sps:$4 sm:$0xff]  }
  0x17   :  { %1624 = vmatpush1.bf16.msra.mxu0 %v4917_v22  ;;  %v4949_v44 = vld [vmem:[%s7491_s1 + $0x164] ss:$16 sps:$4 sm:$0xff]   ;;  %v4953_v49 = vld [vmem:[%s7491_s1 + $0x160] ss:$16 sps:$4 sm:$0xff]  }
  0x18   :  { %1665 = vmatpush1.bf16.msra.mxu1 %v4918_v23  ;;  %1625 = vmatprep.subr.bf16.mxu0 %v4919_v24  ;;  %v4951_v45 = vld [vmem:[%s7491_s1 + $0x364] ss:$16 sps:$4 sm:$0xff]   ;;  %v4954_v50 = vld [vmem:[%s7491_s1 + $0x360] ss:$16 sps:$4 sm:$0xff]  }
  0x19   :  { %1666 = vmatprep.subr.bf16.mxu1 %v4921_v25  ;;  %v45_v46 = vld [vmem:[%s7492_s0] sm:$0xff] }
  0x1a   :  { %v5882_v47 = vcombine.high %v45_v46, %v45_v46  ;;  %v4955_v52 = vld [vmem:[%s7491_s1 + $0x184] ss:$16 sps:$4 sm:$0xff]   ;;  %v4959_v54 = vld [vmem:[%s7491_s1 + $0x180] ss:$16 sps:$4 sm:$0xff]   ;;  %v5951_v6 = vcombine.low %v45_v46, %v45_v46 }
  0x1b   :  { %1626 = vmatpush1.bf16.msra.mxu0 %v4923_v26  ;;  %v4957_v53 = vld [vmem:[%s7491_s1 + $0x384] ss:$16 sps:$4 sm:$0xff]   ;;  %v4960_v55 = vld [vmem:[%s7491_s1 + $0x380] ss:$16 sps:$4 sm:$0xff]  }
  0x1c   :  { %1667 = vmatpush1.bf16.msra.mxu1 %v4924_v27  ;;  %1627 = vmatprep.subr.bf16.mxu0 %v4925_v28  ;;  %v4961_v56 = vld [vmem:[%s7491_s1 + $0x1a4] ss:$16 sps:$4 sm:$0xff]   ;;  %v4965_v58 = vld [vmem:[%s7491_s1 + $0x1a0] ss:$16 sps:$4 sm:$0xff]  }
  0x1d   :  { %1668 = vmatprep.subr.bf16.mxu1 %v4927_v29  ;;  %1645 = vmatprep.mubr.bf16.mxu0 %v5882_v47  ;;  %v4963_v57 = vld [vmem:[%s7491_s1 + $0x3a4] ss:$16 sps:$4 sm:$0xff]   ;;  %v4966_v59 = vld [vmem:[%s7491_s1 + $0x3a0] ss:$16 sps:$4 sm:$0xff]  }
  0x1e   :  { %v4967_v60 = vld [vmem:[%s7491_s1 + $0x1c4] ss:$16 sps:$4 sm:$0xff]   ;;  %v4971_v62 = vld [vmem:[%s7491_s1 + $0x1c0] ss:$16 sps:$4 sm:$0xff]  }
  0x1f   :  { %1628 = vmatpush1.bf16.msra.mxu0 %v4929_v30  ;;  %v4969_v61 = vld [vmem:[%s7491_s1 + $0x3c4] ss:$16 sps:$4 sm:$0xff]   ;;  %v4972_v63 = vld [vmem:[%s7491_s1 + $0x3c0] ss:$16 sps:$4 sm:$0xff]  }
  0x20   :  { %1669 = vmatpush1.bf16.msra.mxu1 %v4930_v31  ;;  %1629 = vmatprep.subr.bf16.mxu0 %v4931_v32  ;;  %v4973_v0 = vld [vmem:[%s7491_s1 + $0x1e4] ss:$16 sps:$4 sm:$0xff]   ;;  %v4977_v2 = vld [vmem:[%s7491_s1 + $0x1e0] ss:$16 sps:$4 sm:$0xff]  }
  0x21   :  { %1670 = vmatprep.subr.bf16.mxu1 %v4933_v33  ;;  %v4975_v1 = vld [vmem:[%s7491_s1 + $0x3e4] ss:$16 sps:$4 sm:$0xff]   ;;  %v4978_v3 = vld [vmem:[%s7491_s1 + $0x3e0] ss:$16 sps:$4 sm:$0xff]   ;;  %v6037_v33 = vld [vmem:[%s7492_s0 + $0x18] sm:$0xff] }
  0x22   :  { %v4985_v4 = vld [vmem:[%s7491_s1 + $0x404] ss:$16 sps:$4 sm:$0xff]   ;;  %v4983_v8 = vld [vmem:[%s7491_s1 + $0x400] ss:$16 sps:$4 sm:$0xff]  }
  0x23   :  { %1630 = vmatpush1.bf16.msra.mxu0 %v4935_v34  ;;  %v4988_v5 = vld [vmem:[%s7491_s1 + $0x604] ss:$16 sps:$4 sm:$0xff]   ;;  %v4986_v9 = vld [vmem:[%s7491_s1 + $0x600] ss:$16 sps:$4 sm:$0xff]  }
  0x24   :  { %1671 = vmatpush1.bf16.msra.mxu1 %v4936_v35  ;;  %1631 = vmatprep.subr.bf16.mxu0 %v4937_v36  ;;  %v4991_v10 = vld [vmem:[%s7491_s1 + $0x424] ss:$16 sps:$4 sm:$0xff]   ;;  %v4989_v12 = vld [vmem:[%s7491_s1 + $0x420] ss:$16 sps:$4 sm:$0xff]  }
  0x25   :  { %1672 = vmatprep.subr.bf16.mxu1 %v4939_v37  ;;  %v4994_v11 = vld [vmem:[%s7491_s1 + $0x624] ss:$16 sps:$4 sm:$0xff]   ;;  %v4992_v13 = vld [vmem:[%s7491_s1 + $0x620] ss:$16 sps:$4 sm:$0xff]   ;;  %v6051_v37 = vcombine.high %v6037_v33, %v6037_v33 }
  0x26   :  { %v4997_v14 = vld [vmem:[%s7491_s1 + $0x444] ss:$16 sps:$4 sm:$0xff]   ;;  %v4995_v16 = vld [vmem:[%s7491_s1 + $0x440] ss:$16 sps:$4 sm:$0xff]  }
  0x27   :  { %1632 = vmatpush1.bf16.msra.mxu0 %v4941_v38  ;;  %v5000_v15 = vld [vmem:[%s7491_s1 + $0x644] ss:$16 sps:$4 sm:$0xff]   ;;  %v4998_v17 = vld [vmem:[%s7491_s1 + $0x640] ss:$16 sps:$4 sm:$0xff]  }
  0x28   :  { %1673 = vmatpush1.bf16.msra.mxu1 %v4942_v39  ;;  %1633 = vmatprep.subr.bf16.mxu0 %v4943_v40  ;;  %v5003_v18 = vld [vmem:[%s7491_s1 + $0x464] ss:$16 sps:$4 sm:$0xff]   ;;  %v5001_v20 = vld [vmem:[%s7491_s1 + $0x460] ss:$16 sps:$4 sm:$0xff]  }
  0x29   :  { %1674 = vmatprep.subr.bf16.mxu1 %v4945_v41  ;;  %v5006_v19 = vld [vmem:[%s7491_s1 + $0x664] ss:$16 sps:$4 sm:$0xff]   ;;  %v5004_v21 = vld [vmem:[%s7491_s1 + $0x660] ss:$16 sps:$4 sm:$0xff]  }
  0x2a   :  { %v5009_v22 = vld [vmem:[%s7491_s1 + $0x484] ss:$16 sps:$4 sm:$0xff]   ;;  %v5007_v24 = vld [vmem:[%s7491_s1 + $0x480] ss:$16 sps:$4 sm:$0xff]  }
  0x2b   :  { %1634 = vmatpush1.bf16.msra.mxu0 %v4947_v42  ;;  %v5012_v23 = vld [vmem:[%s7491_s1 + $0x684] ss:$16 sps:$4 sm:$0xff]   ;;  %v5010_v25 = vld [vmem:[%s7491_s1 + $0x680] ss:$16 sps:$4 sm:$0xff]  }
  0x2c   :  { %1675 = vmatpush1.bf16.msra.mxu1 %v4948_v43  ;;  %1635 = vmatprep.subr.bf16.mxu0 %v4949_v44  ;;  %v5015_v26 = vld [vmem:[%s7491_s1 + $0x4a4] ss:$16 sps:$4 sm:$0xff]   ;;  %v5013_v28 = vld [vmem:[%s7491_s1 + $0x4a0] ss:$16 sps:$4 sm:$0xff]  }
  0x2d   :  { %1676 = vmatprep.subr.bf16.mxu1 %v4951_v45  ;;  %v5018_v27 = vld [vmem:[%s7491_s1 + $0x6a4] ss:$16 sps:$4 sm:$0xff]   ;;  %v5016_v29 = vld [vmem:[%s7491_s1 + $0x6a0] ss:$16 sps:$4 sm:$0xff]  }
  0x2e   :  { %v5021_v30 = vld [vmem:[%s7491_s1 + $0x4c4] ss:$16 sps:$4 sm:$0xff]   ;;  %v5019_v34 = vld [vmem:[%s7491_s1 + $0x4c0] ss:$16 sps:$4 sm:$0xff]  }
  0x2f   :  { %1636 = vmatpush1.bf16.msra.mxu0 %v4953_v49  ;;  %v5024_v31 = vld [vmem:[%s7491_s1 + $0x6c4] ss:$16 sps:$4 sm:$0xff]   ;;  %v5022_v35 = vld [vmem:[%s7491_s1 + $0x6c0] ss:$16 sps:$4 sm:$0xff]  }
  0x30   :  { %1677 = vmatpush1.bf16.msra.mxu1 %v4954_v50  ;;  %1637 = vmatprep.subr.bf16.mxu0 %v4955_v52  ;;  %v6032_v32 = vld [vmem:[%s7492_s0 + $0x10] sm:$0xff] }
  0x31   :  { %1678 = vmatprep.subr.bf16.mxu1 %v4957_v53  ;;  %v6047_v36 = vcombine.high %v6032_v32, %v6032_v32  ;;  %v5027_v38 = vld [vmem:[%s7491_s1 + $0x4e4] ss:$16 sps:$4 sm:$0xff]   ;;  %v5025_v40 = vld [vmem:[%s7491_s1 + $0x4e0] ss:$16 sps:$4 sm:$0xff]  }
  0x32   :  { %v5030_v39 = vld [vmem:[%s7491_s1 + $0x6e4] ss:$16 sps:$4 sm:$0xff]   ;;  %v5028_v41 = vld [vmem:[%s7491_s1 + $0x6e0] ss:$16 sps:$4 sm:$0xff]  }
  0x33   :  { %1638 = vmatpush1.bf16.msra.mxu0 %v4959_v54  ;;  %v5033_v42 = vld [vmem:[%s7491_s1 + $0x504] ss:$16 sps:$4 sm:$0xff]   ;;  %v5031_v44 = vld [vmem:[%s7491_s1 + $0x500] ss:$16 sps:$4 sm:$0xff]  }
  0x34   :  { %1679 = vmatpush1.bf16.msra.mxu1 %v4960_v55  ;;  %1639 = vmatprep.subr.bf16.mxu0 %v4961_v56  ;;  %v5036_v43 = vld [vmem:[%s7491_s1 + $0x704] ss:$16 sps:$4 sm:$0xff]   ;;  %v5034_v45 = vld [vmem:[%s7491_s1 + $0x700] ss:$16 sps:$4 sm:$0xff]  }
  0x35   :  { %1680 = vmatprep.subr.bf16.mxu1 %v4963_v57  ;;  %v5039_v46 = vld [vmem:[%s7491_s1 + $0x524] ss:$16 sps:$4 sm:$0xff]   ;;  %v5037_v49 = vld [vmem:[%s7491_s1 + $0x520] ss:$16 sps:$4 sm:$0xff]  }
  0x36   :  { %v5042_v48 = vld [vmem:[%s7491_s1 + $0x724] ss:$16 sps:$4 sm:$0xff]   ;;  %v5040_v50 = vld [vmem:[%s7491_s1 + $0x720] ss:$16 sps:$4 sm:$0xff]  }
  0x37   :  { %1640 = vmatpush1.bf16.msra.mxu0 %v4965_v58  ;;  %v5045_v52 = vld [vmem:[%s7491_s1 + $0x544] ss:$16 sps:$4 sm:$0xff]   ;;  %v5043_v54 = vld [vmem:[%s7491_s1 + $0x540] ss:$16 sps:$4 sm:$0xff]  }
  0x38   :  { %1681 = vmatpush1.bf16.msra.mxu1 %v4966_v59  ;;  %1641 = vmatprep.subr.bf16.mxu0 %v4967_v60  ;;  %v5048_v53 = vld [vmem:[%s7491_s1 + $0x744] ss:$16 sps:$4 sm:$0xff]   ;;  %v5046_v55 = vld [vmem:[%s7491_s1 + $0x740] ss:$16 sps:$4 sm:$0xff]  }
  0x39   :  { %1682 = vmatprep.subr.bf16.mxu1 %v4969_v61  ;;  %v5051_v56 = vld [vmem:[%s7491_s1 + $0x564] ss:$16 sps:$4 sm:$0xff]   ;;  %v5049_v58 = vld [vmem:[%s7491_s1 + $0x560] ss:$16 sps:$4 sm:$0xff]  }
  0x3a   :  { %v5054_v57 = vld [vmem:[%s7491_s1 + $0x764] ss:$16 sps:$4 sm:$0xff]   ;;  %v5052_v59 = vld [vmem:[%s7491_s1 + $0x760] ss:$16 sps:$4 sm:$0xff]  }
  0x3b   :  { %1642 = vmatpush1.bf16.msra.mxu0 %v4971_v62  ;;  %v5057_v60 = vld [vmem:[%s7491_s1 + $0x584] ss:$16 sps:$4 sm:$0xff]   ;;  %v5055_v62 = vld [vmem:[%s7491_s1 + $0x580] ss:$16 sps:$4 sm:$0xff]  }
  0x3c   :  { %1683 = vmatpush1.bf16.msra.mxu1 %v4972_v63  ;;  %1643 = vmatprep.subr.bf16.mxu0 %v4973_v0  ;;  %v5060_v61 = vld [vmem:[%s7491_s1 + $0x784] ss:$16 sps:$4 sm:$0xff]   ;;  %v5058_v63 = vld [vmem:[%s7491_s1 + $0x780] ss:$16 sps:$4 sm:$0xff]  }
  0x3d   :  { %1684 = vmatprep.subr.bf16.mxu1 %v4975_v1  ;;  %v5063_v0 = vld [vmem:[%s7491_s1 + $0x5a4] ss:$16 sps:$4 sm:$0xff]  }
  0x3e   :  { %v5066_v1 = vld [vmem:[%s7491_s1 + $0x7a4] ss:$16 sps:$4 sm:$0xff]  }
  0x3f   :  { %1644 = vmatpush1.bf16.msra.mxu0 %v4977_v2  ;;  %v5061_v2 = vld [vmem:[%s7491_s1 + $0x5a0] ss:$16 sps:$4 sm:$0xff]  }
  0x40   :  { %1685 = vmatpush1.bf16.msra.mxu1 %v4978_v3  ;;  %1695 = vmatprep.subr.bf16.mxu0 %v4985_v4  ;;  %v5064_v3 = vld [vmem:[%s7491_s1 + $0x7a0] ss:$16 sps:$4 sm:$0xff]   ;;  %v5069_v4 = vld [vmem:[%s7491_s1 + $0x5c4] ss:$16 sps:$4 sm:$0xff]  }
  0x41   :  { %1736 = vmatprep.subr.bf16.mxu1 %v4988_v5  ;;  %v5072_v5 = vld [vmem:[%s7491_s1 + $0x7c4] ss:$16 sps:$4 sm:$0xff]  }
  0x42   :  { %1646 = vmatmul.mubr.bf16.vlgmr.msra.gmra.mrb[0].mxu0 %v5951_v6 }
  0x43   :  { %1687 = vmatmul.mubr.bf16.vlgmr.msra.gmra.mrb[0].mxu1 %v5953_v7  ;;  %1696 = vmatpush1.bf16.msra.mxu0 %v4983_v8  ;;  %v5067_v8 = vld [vmem:[%s7491_s1 + $0x5c0] ss:$16 sps:$4 sm:$0xff]  }
  0x44   :  { %1737 = vmatpush1.bf16.msra.mxu1 %v4986_v9  ;;  %1697 = vmatprep.subr.bf16.mxu0 %v4991_v10  ;;  %v5070_v9 = vld [vmem:[%s7491_s1 + $0x7c0] ss:$16 sps:$4 sm:$0xff]   ;;  %v5075_v10 = vld [vmem:[%s7491_s1 + $0x5e4] ss:$16 sps:$4 sm:$0xff]  }
  0x45   :  { %1738 = vmatprep.subr.bf16.mxu1 %v4994_v11  ;;  %1727 = vmatprep.mubr.bf16.mxu0 %v6047_v36  ;;  %v5078_v11 = vld [vmem:[%s7491_s1 + $0x7e4] ss:$16 sps:$4 sm:$0xff]  }
  0x46   :  { %1768 = vmatprep.mubr.bf16.mxu1 %v6051_v37 }
  0x47   :  { %1698 = vmatpush1.bf16.msra.mxu0 %v4989_v12  ;;  %v5073_v12 = vld [vmem:[%s7491_s1 + $0x5e0] ss:$16 sps:$4 sm:$0xff]  }
  0x48   :  { %1739 = vmatpush1.bf16.msra.mxu1 %v4992_v13  ;;  %1699 = vmatprep.subr.bf16.mxu0 %v4997_v14  ;;  %v5076_v13 = vld [vmem:[%s7491_s1 + $0x7e0] ss:$16 sps:$4 sm:$0xff]   ;;  %v5085_v14 = vld [vmem:[%s7491_s1 + $0xc] ss:$16 sps:$4 sm:$0xff]  }
  0x49   :  { %1740 = vmatprep.subr.bf16.mxu1 %v5000_v15  ;;  %v5088_v15 = vld [vmem:[%s7491_s1 + $0x20c] ss:$16 sps:$4 sm:$0xff]  }
  0x4b   :  { %1700 = vmatpush1.bf16.msra.mxu0 %v4995_v16  ;;  %v6171_v16 = vcombine.low %v6032_v32, %v6032_v32  ;;  %v5107_v32 = vld [vmem:[%s7491_s1 + $0x88] ss:$16 sps:$4 sm:$0xff]  }
  0x4c   :  { %1741 = vmatpush1.bf16.msra.mxu1 %v4998_v17  ;;  %1701 = vmatprep.subr.bf16.mxu0 %v5003_v18  ;;  %v6175_v17 = vcombine.low %v6037_v33, %v6037_v33  ;;  %v5083_v18 = vld [vmem:[%s7491_s1 + $0x8] ss:$16 sps:$4 sm:$0xff]  }
  0x4d   :  { %1742 = vmatprep.subr.bf16.mxu1 %v5006_v19  ;;  %v5086_v19 = vld [vmem:[%s7491_s1 + $0x208] ss:$16 sps:$4 sm:$0xff]  }
  0x4e   :  { %v5110_v33 = vld [vmem:[%s7491_s1 + $0x288] ss:$16 sps:$4 sm:$0xff]  }
  0x4f   :  { %1702 = vmatpush1.bf16.msra.mxu0 %v5001_v20  ;;  %v5091_v20 = vld [vmem:[%s7491_s1 + $0x2c] ss:$16 sps:$4 sm:$0xff]  }
  0x50   :  { %1743 = vmatpush1.bf16.msra.mxu1 %v5004_v21  ;;  %1703 = vmatprep.subr.bf16.mxu0 %v5009_v22  ;;  %v5094_v21 = vld [vmem:[%s7491_s1 + $0x22c] ss:$16 sps:$4 sm:$0xff]   ;;  %v5089_v22 = vld [vmem:[%s7491_s1 + $0x28] ss:$16 sps:$4 sm:$0xff]  }
  0x51   :  { %1744 = vmatprep.subr.bf16.mxu1 %v5012_v23  ;;  %v5092_v23 = vld [vmem:[%s7491_s1 + $0x228] ss:$16 sps:$4 sm:$0xff]  }
  0x53   :  { %1704 = vmatpush1.bf16.msra.mxu0 %v5007_v24  ;;  %v5097_v24 = vld [vmem:[%s7491_s1 + $0x4c] ss:$16 sps:$4 sm:$0xff]  }
  0x54   :  { %1745 = vmatpush1.bf16.msra.mxu1 %v5010_v25  ;;  %1705 = vmatprep.subr.bf16.mxu0 %v5015_v26  ;;  %v5100_v25 = vld [vmem:[%s7491_s1 + $0x24c] ss:$16 sps:$4 sm:$0xff]   ;;  %v5095_v26 = vld [vmem:[%s7491_s1 + $0x48] ss:$16 sps:$4 sm:$0xff]  }
  0x55   :  { %1746 = vmatprep.subr.bf16.mxu1 %v5018_v27  ;;  %v5098_v27 = vld [vmem:[%s7491_s1 + $0x248] ss:$16 sps:$4 sm:$0xff]  }
  0x57   :  { %1706 = vmatpush1.bf16.msra.mxu0 %v5013_v28  ;;  %v5103_v28 = vld [vmem:[%s7491_s1 + $0x6c] ss:$16 sps:$4 sm:$0xff]  }
  0x58   :  { %1747 = vmatpush1.bf16.msra.mxu1 %v5016_v29  ;;  %1707 = vmatprep.subr.bf16.mxu0 %v5021_v30  ;;  %v5104_v29 = vld [vmem:[%s7491_s1 + $0x268] ss:$16 sps:$4 sm:$0xff]   ;;  %v5109_v30 = vld [vmem:[%s7491_s1 + $0x8c] ss:$16 sps:$4 sm:$0xff]  }
  0x59   :  { %1748 = vmatprep.subr.bf16.mxu1 %v5024_v31  ;;  %v5112_v31 = vld [vmem:[%s7491_s1 + $0x28c] ss:$16 sps:$4 sm:$0xff]  }
  0x5b   :  { %1708 = vmatpush1.bf16.msra.mxu0 %v5019_v34  ;;  %v5115_v34 = vld [vmem:[%s7491_s1 + $0xac] ss:$16 sps:$4 sm:$0xff]  }
  0x5c   :  { %1749 = vmatpush1.bf16.msra.mxu1 %v5022_v35  ;;  %1709 = vmatprep.subr.bf16.mxu0 %v5027_v38  ;;  %v5118_v35 = vld [vmem:[%s7491_s1 + $0x2ac] ss:$16 sps:$4 sm:$0xff]   ;;  %v5113_v38 = vld [vmem:[%s7491_s1 + $0xa8] ss:$16 sps:$4 sm:$0xff]  }
  0x5d   :  { %1750 = vmatprep.subr.bf16.mxu1 %v5030_v39  ;;  %v5116_v39 = vld [vmem:[%s7491_s1 + $0x2a8] ss:$16 sps:$4 sm:$0xff]  }
  0x5f   :  { %1710 = vmatpush1.bf16.msra.mxu0 %v5025_v40  ;;  %v5121_v40 = vld [vmem:[%s7491_s1 + $0xcc] ss:$16 sps:$4 sm:$0xff]  }
  0x60   :  { %1751 = vmatpush1.bf16.msra.mxu1 %v5028_v41  ;;  %1711 = vmatprep.subr.bf16.mxu0 %v5033_v42  ;;  %v5124_v41 = vld [vmem:[%s7491_s1 + $0x2cc] ss:$16 sps:$4 sm:$0xff]   ;;  %v5119_v42 = vld [vmem:[%s7491_s1 + $0xc8] ss:$16 sps:$4 sm:$0xff]  }
  0x61   :  { %1752 = vmatprep.subr.bf16.mxu1 %v5036_v43  ;;  %v5122_v43 = vld [vmem:[%s7491_s1 + $0x2c8] ss:$16 sps:$4 sm:$0xff]  }
  0x63   :  { %1712 = vmatpush1.bf16.msra.mxu0 %v5031_v44  ;;  %v5127_v44 = vld [vmem:[%s7491_s1 + $0xec] ss:$16 sps:$4 sm:$0xff]  }
  0x64   :  { %1753 = vmatpush1.bf16.msra.mxu1 %v5034_v45  ;;  %1713 = vmatprep.subr.bf16.mxu0 %v5039_v46  ;;  %v5130_v45 = vld [vmem:[%s7491_s1 + $0x2ec] ss:$16 sps:$4 sm:$0xff]   ;;  %v5125_v46 = vld [vmem:[%s7491_s1 + $0xe8] ss:$16 sps:$4 sm:$0xff]  }
  0x65   :  { %1754 = vmatprep.subr.bf16.mxu1 %v5042_v48  ;;  %v5128_v48 = vld [vmem:[%s7491_s1 + $0x2e8] ss:$16 sps:$4 sm:$0xff]  }
  0x67   :  { %1714 = vmatpush1.bf16.msra.mxu0 %v5037_v49  ;;  %v5133_v49 = vld [vmem:[%s7491_s1 + $0x10c] ss:$16 sps:$4 sm:$0xff]  }
  0x68   :  { %1755 = vmatpush1.bf16.msra.mxu1 %v5040_v50  ;;  %1715 = vmatprep.subr.bf16.mxu0 %v5045_v52  ;;  %v5136_v50 = vld [vmem:[%s7491_s1 + $0x30c] ss:$16 sps:$4 sm:$0xff]   ;;  %v5131_v52 = vld [vmem:[%s7491_s1 + $0x108] ss:$16 sps:$4 sm:$0xff]  }
  0x69   :  { %1756 = vmatprep.subr.bf16.mxu1 %v5048_v53  ;;  %v5134_v53 = vld [vmem:[%s7491_s1 + $0x308] ss:$16 sps:$4 sm:$0xff]  }
  0x6b   :  { %1716 = vmatpush1.bf16.msra.mxu0 %v5043_v54  ;;  %v5139_v54 = vld [vmem:[%s7491_s1 + $0x12c] ss:$16 sps:$4 sm:$0xff]  }
  0x6c   :  { %1757 = vmatpush1.bf16.msra.mxu1 %v5046_v55  ;;  %1717 = vmatprep.subr.bf16.mxu0 %v5051_v56  ;;  %v5142_v55 = vld [vmem:[%s7491_s1 + $0x32c] ss:$16 sps:$4 sm:$0xff]   ;;  %v5137_v56 = vld [vmem:[%s7491_s1 + $0x128] ss:$16 sps:$4 sm:$0xff]  }
  0x6d   :  { %1758 = vmatprep.subr.bf16.mxu1 %v5054_v57  ;;  %v5140_v57 = vld [vmem:[%s7491_s1 + $0x328] ss:$16 sps:$4 sm:$0xff]  }
  0x6f   :  { %1718 = vmatpush1.bf16.msra.mxu0 %v5049_v58  ;;  %v5145_v58 = vld [vmem:[%s7491_s1 + $0x14c] ss:$16 sps:$4 sm:$0xff]  }
  0x70   :  { %1759 = vmatpush1.bf16.msra.mxu1 %v5052_v59  ;;  %1719 = vmatprep.subr.bf16.mxu0 %v5057_v60  ;;  %v5148_v59 = vld [vmem:[%s7491_s1 + $0x34c] ss:$16 sps:$4 sm:$0xff]   ;;  %v5143_v60 = vld [vmem:[%s7491_s1 + $0x148] ss:$16 sps:$4 sm:$0xff]  }
  0x71   :  { %1760 = vmatprep.subr.bf16.mxu1 %v5060_v61  ;;  %v5146_v61 = vld [vmem:[%s7491_s1 + $0x348] ss:$16 sps:$4 sm:$0xff]  }
  0x73   :  { %1720 = vmatpush1.bf16.msra.mxu0 %v5055_v62  ;;  %v5151_v62 = vld [vmem:[%s7491_s1 + $0x16c] ss:$16 sps:$4 sm:$0xff]  }
  0x74   :  { %1761 = vmatpush1.bf16.msra.mxu1 %v5058_v63  ;;  %1721 = vmatprep.subr.bf16.mxu0 %v5063_v0  ;;  %v5154_v63 = vld [vmem:[%s7491_s1 + $0x36c] ss:$16 sps:$4 sm:$0xff]   ;;  %v5149_v0 = vld [vmem:[%s7491_s1 + $0x168] ss:$16 sps:$4 sm:$0xff]  }
  0x75   :  { %1762 = vmatprep.subr.bf16.mxu1 %v5066_v1  ;;  %v5152_v1 = vld [vmem:[%s7491_s1 + $0x368] ss:$16 sps:$4 sm:$0xff]  }
  0x77   :  { %1722 = vmatpush1.bf16.msra.mxu0 %v5061_v2  ;;  %v5157_v2 = vld [vmem:[%s7491_s1 + $0x18c] ss:$16 sps:$4 sm:$0xff]  }
  0x78   :  { %1763 = vmatpush1.bf16.msra.mxu1 %v5064_v3  ;;  %1723 = vmatprep.subr.bf16.mxu0 %v5069_v4  ;;  %v5160_v3 = vld [vmem:[%s7491_s1 + $0x38c] ss:$16 sps:$4 sm:$0xff]   ;;  %v5155_v4 = vld [vmem:[%s7491_s1 + $0x188] ss:$16 sps:$4 sm:$0xff]  }
  0x79   :  { %1764 = vmatprep.subr.bf16.mxu1 %v5072_v5  ;;  %v5158_v5 = vld [vmem:[%s7491_s1 + $0x388] ss:$16 sps:$4 sm:$0xff]  }
  0x7b   :  { %1724 = vmatpush1.bf16.msra.mxu0 %v5067_v8  ;;  %v5163_v8 = vld [vmem:[%s7491_s1 + $0x1ac] ss:$16 sps:$4 sm:$0xff]  }
  0x7c   :  { %1765 = vmatpush1.bf16.msra.mxu1 %v5070_v9  ;;  %1725 = vmatprep.subr.bf16.mxu0 %v5075_v10  ;;  %v5166_v9 = vld [vmem:[%s7491_s1 + $0x3ac] ss:$16 sps:$4 sm:$0xff]   ;;  %v5161_v10 = vld [vmem:[%s7491_s1 + $0x1a8] ss:$16 sps:$4 sm:$0xff]  }
  0x7d   :  { %1766 = vmatprep.subr.bf16.mxu1 %v5078_v11  ;;  %v5164_v11 = vld [vmem:[%s7491_s1 + $0x3a8] ss:$16 sps:$4 sm:$0xff]  }
  0x7f   :  { %1726 = vmatpush1.bf16.msra.mxu0 %v5073_v12  ;;  %v5169_v12 = vld [vmem:[%s7491_s1 + $0x1cc] ss:$16 sps:$4 sm:$0xff]  }
  0x80   :  { %1767 = vmatpush1.bf16.msra.mxu1 %v5076_v13  ;;  %1777 = vmatprep.subr.bf16.mxu0 %v5085_v14  ;;  %v5172_v13 = vld [vmem:[%s7491_s1 + $0x3cc] ss:$16 sps:$4 sm:$0xff]   ;;  %v5167_v14 = vld [vmem:[%s7491_s1 + $0x1c8] ss:$16 sps:$4 sm:$0xff]  }
  0x81   :  { %1818 = vmatprep.subr.bf16.mxu1 %v5088_v15  ;;  %v5170_v15 = vld [vmem:[%s7491_s1 + $0x3c8] ss:$16 sps:$4 sm:$0xff]  }
  0x82   :  { %1728 = vmatmul.mubr.bf16.vlgmr.msra.gmra.mrb[4].mxu0 %v6171_v16 }
  0x83   :  { %1769 = vmatmul.mubr.bf16.vlgmr.msra.gmra.mrb[4].mxu1 %v6175_v17  ;;  %1778 = vmatpush1.bf16.msra.mxu0 %v5083_v18  ;;  %v5175_v18 = vld [vmem:[%s7491_s1 + $0x1ec] ss:$16 sps:$4 sm:$0xff]  }
  0x84   :  { %1819 = vmatpush1.bf16.msra.mxu1 %v5086_v19  ;;  %1779 = vmatprep.subr.bf16.mxu0 %v5091_v20  ;;  %v5178_v19 = vld [vmem:[%s7491_s1 + $0x3ec] ss:$16 sps:$4 sm:$0xff]   ;;  %v5173_v20 = vld [vmem:[%s7491_s1 + $0x1e8] ss:$16 sps:$4 sm:$0xff]  }
  0x85   :  { %1820 = vmatprep.subr.bf16.mxu1 %v5094_v21  ;;  %1809 = vmatprep.mubr.bf16.mxu0 %v5882_v47  ;;  %v5106_v47 = vld [vmem:[%s7491_s1 + $0x26c] ss:$16 sps:$4 sm:$0xff]   ;;  %v5176_v21 = vld [vmem:[%s7491_s1 + $0x3e8] ss:$16 sps:$4 sm:$0xff]  }
  0x86   :  { %1850 = vmatprep.mubr.bf16.mxu1 %v5893_v51  ;;  %v5101_v51 = vld [vmem:[%s7491_s1 + $0x68] ss:$16 sps:$4 sm:$0xff]  }
  0x87   :  { %1780 = vmatpush1.bf16.msra.mxu0 %v5089_v22  ;;  %v5181_v22 = vld [vmem:[%s7491_s1 + $0x40c] ss:$16 sps:$4 sm:$0xff]  }
  0x88   :  { %1821 = vmatpush1.bf16.msra.mxu1 %v5092_v23  ;;  %1781 = vmatprep.subr.bf16.mxu0 %v5097_v24  ;;  %v5184_v23 = vld [vmem:[%s7491_s1 + $0x60c] ss:$16 sps:$4 sm:$0xff]   ;;  %v5179_v24 = vld [vmem:[%s7491_s1 + $0x408] ss:$16 sps:$4 sm:$0xff]  }
  0x89   :  { %1822 = vmatprep.subr.bf16.mxu1 %v5100_v25  ;;  %v5182_v25 = vld [vmem:[%s7491_s1 + $0x608] ss:$16 sps:$4 sm:$0xff]  }
  0x8b   :  { %1782 = vmatpush1.bf16.msra.mxu0 %v5095_v26  ;;  %v5187_v26 = vld [vmem:[%s7491_s1 + $0x42c] ss:$16 sps:$4 sm:$0xff]  }
  0x8c   :  { %1823 = vmatpush1.bf16.msra.mxu1 %v5098_v27  ;;  %1783 = vmatprep.subr.bf16.mxu0 %v5103_v28  ;;  %v5190_v27 = vld [vmem:[%s7491_s1 + $0x62c] ss:$16 sps:$4 sm:$0xff]   ;;  %v5185_v28 = vld [vmem:[%s7491_s1 + $0x428] ss:$16 sps:$4 sm:$0xff]  }
  0x8d   :  { %1824 = vmatprep.subr.bf16.mxu1 %v5106_v47  ;;  %v5188_v47 = vld [vmem:[%s7491_s1 + $0x628] ss:$16 sps:$4 sm:$0xff]  }
  0x8f   :  { %1784 = vmatpush1.bf16.msra.mxu0 %v5101_v51  ;;  %v5193_v51 = vld [vmem:[%s7491_s1 + $0x44c] ss:$16 sps:$4 sm:$0xff]  }
  0x90   :  { %1825 = vmatpush1.bf16.msra.mxu1 %v5104_v29  ;;  %1785 = vmatprep.subr.bf16.mxu0 %v5109_v30  ;;  %v5194_v29 = vld [vmem:[%s7491_s1 + $0x648] ss:$16 sps:$4 sm:$0xff]   ;;  %v5199_v30 = vld [vmem:[%s7491_s1 + $0x46c] ss:$16 sps:$4 sm:$0xff]  }
  0x91   :  { %1826 = vmatprep.subr.bf16.mxu1 %v5112_v31  ;;  %v5200_v31 = vld [vmem:[%s7491_s1 + $0x668] ss:$16 sps:$4 sm:$0xff]  }
  0x93   :  { %1786 = vmatpush1.bf16.msra.mxu0 %v5107_v32  ;;  %v5205_v32 = vld [vmem:[%s7491_s1 + $0x48c] ss:$16 sps:$4 sm:$0xff]  }
  0x94   :  { %1827 = vmatpush1.bf16.msra.mxu1 %v5110_v33  ;;  %1787 = vmatprep.subr.bf16.mxu0 %v5115_v34  ;;  %v5208_v33 = vld [vmem:[%s7491_s1 + $0x68c] ss:$16 sps:$4 sm:$0xff]   ;;  %v5203_v34 = vld [vmem:[%s7491_s1 + $0x488] ss:$16 sps:$4 sm:$0xff]  }
  0x95   :  { %1828 = vmatprep.subr.bf16.mxu1 %v5118_v35  ;;  %v5206_v35 = vld [vmem:[%s7491_s1 + $0x688] ss:$16 sps:$4 sm:$0xff]  }
  0x97   :  { %1788 = vmatpush1.bf16.msra.mxu0 %v5113_v38  ;;  %v5211_v38 = vld [vmem:[%s7491_s1 + $0x4ac] ss:$16 sps:$4 sm:$0xff]  }
  0x98   :  { %1829 = vmatpush1.bf16.msra.mxu1 %v5116_v39  ;;  %1789 = vmatprep.subr.bf16.mxu0 %v5121_v40  ;;  %v5214_v39 = vld [vmem:[%s7491_s1 + $0x6ac] ss:$16 sps:$4 sm:$0xff]   ;;  %v5209_v40 = vld [vmem:[%s7491_s1 + $0x4a8] ss:$16 sps:$4 sm:$0xff]  }
  0x99   :  { %1830 = vmatprep.subr.bf16.mxu1 %v5124_v41  ;;  %v5212_v41 = vld [vmem:[%s7491_s1 + $0x6a8] ss:$16 sps:$4 sm:$0xff]  }
  0x9b   :  { %1790 = vmatpush1.bf16.msra.mxu0 %v5119_v42  ;;  %v5217_v42 = vld [vmem:[%s7491_s1 + $0x4cc] ss:$16 sps:$4 sm:$0xff]  }
  0x9c   :  { %1831 = vmatpush1.bf16.msra.mxu1 %v5122_v43  ;;  %1791 = vmatprep.subr.bf16.mxu0 %v5127_v44  ;;  %v5220_v43 = vld [vmem:[%s7491_s1 + $0x6cc] ss:$16 sps:$4 sm:$0xff]   ;;  %v5215_v44 = vld [vmem:[%s7491_s1 + $0x4c8] ss:$16 sps:$4 sm:$0xff]  }
  0x9d   :  { %1832 = vmatprep.subr.bf16.mxu1 %v5130_v45  ;;  %v5218_v45 = vld [vmem:[%s7491_s1 + $0x6c8] ss:$16 sps:$4 sm:$0xff]  }
  0x9f   :  { %1792 = vmatpush1.bf16.msra.mxu0 %v5125_v46  ;;  %v5223_v46 = vld [vmem:[%s7491_s1 + $0x4ec] ss:$16 sps:$4 sm:$0xff]  }
  0xa0   :  { %1833 = vmatpush1.bf16.msra.mxu1 %v5128_v48  ;;  %1793 = vmatprep.subr.bf16.mxu0 %v5133_v49  ;;  %v5226_v48 = vld [vmem:[%s7491_s1 + $0x6ec] ss:$16 sps:$4 sm:$0xff]   ;;  %v5221_v49 = vld [vmem:[%s7491_s1 + $0x4e8] ss:$16 sps:$4 sm:$0xff]  }
  0xa1   :  { %1834 = vmatprep.subr.bf16.mxu1 %v5136_v50  ;;  %v5224_v50 = vld [vmem:[%s7491_s1 + $0x6e8] ss:$16 sps:$4 sm:$0xff]  }
  0xa3   :  { %1794 = vmatpush1.bf16.msra.mxu0 %v5131_v52  ;;  %v5229_v52 = vld [vmem:[%s7491_s1 + $0x50c] ss:$16 sps:$4 sm:$0xff]  }
  0xa4   :  { %1835 = vmatpush1.bf16.msra.mxu1 %v5134_v53  ;;  %1795 = vmatprep.subr.bf16.mxu0 %v5139_v54  ;;  %v5232_v53 = vld [vmem:[%s7491_s1 + $0x70c] ss:$16 sps:$4 sm:$0xff]   ;;  %v5227_v54 = vld [vmem:[%s7491_s1 + $0x508] ss:$16 sps:$4 sm:$0xff]  }
  0xa5   :  { %1836 = vmatprep.subr.bf16.mxu1 %v5142_v55  ;;  %v5230_v55 = vld [vmem:[%s7491_s1 + $0x708] ss:$16 sps:$4 sm:$0xff]  }
  0xa7   :  { %1796 = vmatpush1.bf16.msra.mxu0 %v5137_v56  ;;  %v5235_v56 = vld [vmem:[%s7491_s1 + $0x52c] ss:$16 sps:$4 sm:$0xff]  }
  0xa8   :  { %1837 = vmatpush1.bf16.msra.mxu1 %v5140_v57  ;;  %1797 = vmatprep.subr.bf16.mxu0 %v5145_v58  ;;  %v5238_v57 = vld [vmem:[%s7491_s1 + $0x72c] ss:$16 sps:$4 sm:$0xff]   ;;  %v5233_v58 = vld [vmem:[%s7491_s1 + $0x528] ss:$16 sps:$4 sm:$0xff]  }
  0xa9   :  { %1838 = vmatprep.subr.bf16.mxu1 %v5148_v59  ;;  %v5236_v59 = vld [vmem:[%s7491_s1 + $0x728] ss:$16 sps:$4 sm:$0xff]  }
  0xab   :  { %1798 = vmatpush1.bf16.msra.mxu0 %v5143_v60  ;;  %v5241_v60 = vld [vmem:[%s7491_s1 + $0x54c] ss:$16 sps:$4 sm:$0xff]  }
  0xac   :  { %1839 = vmatpush1.bf16.msra.mxu1 %v5146_v61  ;;  %1799 = vmatprep.subr.bf16.mxu0 %v5151_v62  ;;  %v5244_v61 = vld [vmem:[%s7491_s1 + $0x74c] ss:$16 sps:$4 sm:$0xff]   ;;  %v5239_v62 = vld [vmem:[%s7491_s1 + $0x548] ss:$16 sps:$4 sm:$0xff]  }
  0xad   :  { %1840 = vmatprep.subr.bf16.mxu1 %v5154_v63  ;;  %v5242_v63 = vld [vmem:[%s7491_s1 + $0x748] ss:$16 sps:$4 sm:$0xff]  }
  0xaf   :  { %1800 = vmatpush1.bf16.msra.mxu0 %v5149_v0  ;;  %v5247_v0 = vld [vmem:[%s7491_s1 + $0x56c] ss:$16 sps:$4 sm:$0xff]  }
  0xb0   :  { %1841 = vmatpush1.bf16.msra.mxu1 %v5152_v1  ;;  %1801 = vmatprep.subr.bf16.mxu0 %v5157_v2  ;;  %v5250_v1 = vld [vmem:[%s7491_s1 + $0x76c] ss:$16 sps:$4 sm:$0xff]   ;;  %v5245_v2 = vld [vmem:[%s7491_s1 + $0x568] ss:$16 sps:$4 sm:$0xff]  }
  0xb1   :  { %1842 = vmatprep.subr.bf16.mxu1 %v5160_v3  ;;  %v5248_v3 = vld [vmem:[%s7491_s1 + $0x768] ss:$16 sps:$4 sm:$0xff]  }
  0xb3   :  { %1802 = vmatpush1.bf16.msra.mxu0 %v5155_v4  ;;  %v5253_v4 = vld [vmem:[%s7491_s1 + $0x58c] ss:$16 sps:$4 sm:$0xff]  }
  0xb4   :  { %1843 = vmatpush1.bf16.msra.mxu1 %v5158_v5  ;;  %1803 = vmatprep.subr.bf16.mxu0 %v5163_v8  ;;  %v5256_v5 = vld [vmem:[%s7491_s1 + $0x78c] ss:$16 sps:$4 sm:$0xff]   ;;  %v5251_v8 = vld [vmem:[%s7491_s1 + $0x588] ss:$16 sps:$4 sm:$0xff]  }
  0xb5   :  { %1844 = vmatprep.subr.bf16.mxu1 %v5166_v9  ;;  %v5254_v9 = vld [vmem:[%s7491_s1 + $0x788] ss:$16 sps:$4 sm:$0xff]  }
  0xb7   :  { %1804 = vmatpush1.bf16.msra.mxu0 %v5161_v10  ;;  %v5259_v10 = vld [vmem:[%s7491_s1 + $0x5ac] ss:$16 sps:$4 sm:$0xff]  }
  0xb8   :  { %1845 = vmatpush1.bf16.msra.mxu1 %v5164_v11  ;;  %1805 = vmatprep.subr.bf16.mxu0 %v5169_v12  ;;  %v5262_v11 = vld [vmem:[%s7491_s1 + $0x7ac] ss:$16 sps:$4 sm:$0xff]   ;;  %v5257_v12 = vld [vmem:[%s7491_s1 + $0x5a8] ss:$16 sps:$4 sm:$0xff]  }
  0xb9   :  { %1846 = vmatprep.subr.bf16.mxu1 %v5172_v13  ;;  %v5260_v13 = vld [vmem:[%s7491_s1 + $0x7a8] ss:$16 sps:$4 sm:$0xff]  }
  0xbb   :  { %1806 = vmatpush1.bf16.msra.mxu0 %v5167_v14  ;;  %v5265_v14 = vld [vmem:[%s7491_s1 + $0x5cc] ss:$16 sps:$4 sm:$0xff]  }
  0xbc   :  { %1847 = vmatpush1.bf16.msra.mxu1 %v5170_v15  ;;  %1807 = vmatprep.subr.bf16.mxu0 %v5175_v18  ;;  %v5268_v15 = vld [vmem:[%s7491_s1 + $0x7cc] ss:$16 sps:$4 sm:$0xff]   ;;  %v5263_v18 = vld [vmem:[%s7491_s1 + $0x5c8] ss:$16 sps:$4 sm:$0xff]  }
  0xbd   :  { %1848 = vmatprep.subr.bf16.mxu1 %v5178_v19  ;;  %v5266_v19 = vld [vmem:[%s7491_s1 + $0x7c8] ss:$16 sps:$4 sm:$0xff]  }
  0xbf   :  { %1808 = vmatpush1.bf16.msra.mxu0 %v5173_v20  ;;  %v5271_v20 = vld [vmem:[%s7491_s1 + $0x5ec] ss:$16 sps:$4 sm:$0xff]  }
  0xc0   :  { %1849 = vmatpush1.bf16.msra.mxu1 %v5176_v21  ;;  %1859 = vmatprep.subr.bf16.mxu0 %v5181_v22  ;;  %v5274_v21 = vld [vmem:[%s7491_s1 + $0x7ec] ss:$16 sps:$4 sm:$0xff]   ;;  %v5269_v22 = vld [vmem:[%s7491_s1 + $0x5e8] ss:$16 sps:$4 sm:$0xff]  }
  0xc1   :  { %1900 = vmatprep.subr.bf16.mxu1 %v5184_v23  ;;  %v5272_v23 = vld [vmem:[%s7491_s1 + $0x7e8] ss:$16 sps:$4 sm:$0xff]  }
  0xc2   :  { %1810 = vmatmul.mubr.bf16.vlgmr.msra.gmra.mrb[8].mxu0 %v5951_v6  ;;  %v5196_v6 = vld [vmem:[%s7491_s1 + $0x64c] ss:$16 sps:$4 sm:$0xff]  }
  0xc3   :  { %1851 = vmatmul.mubr.bf16.vlgmr.msra.gmra.mrb[8].mxu1 %v5953_v7  ;;  %1860 = vmatpush1.bf16.msra.mxu0 %v5179_v24  ;;  %v5191_v7 = vld [vmem:[%s7491_s1 + $0x448] ss:$16 sps:$4 sm:$0xff]   ;;  %v5277_v24 = vld [vmem:[%s7493_s3 + $0x4] ss:$16 sps:$4 sm:$0xff]  }
  0xc4   :  { %1901 = vmatpush1.bf16.msra.mxu1 %v5182_v25  ;;  %1861 = vmatprep.subr.bf16.mxu0 %v5187_v26  ;;  %v5280_v25 = vld [vmem:[%s7493_s3 + $0xc] ss:$16 sps:$4 sm:$0xff]   ;;  %v5275_v26 = vld [vmem:[%s7493_s3] ss:$16 sps:$4 sm:$0xff]  }
  0xc5   :  { %1902 = vmatprep.subr.bf16.mxu1 %v5190_v27  ;;  %1891 = vmatprep.mubr.bf16.mxu0 %v6047_v36  ;;  %v5202_v36 = vld [vmem:[%s7491_s1 + $0x66c] ss:$16 sps:$4 sm:$0xff]   ;;  %v5278_v27 = vld [vmem:[%s7493_s3 + $0x8] ss:$16 sps:$4 sm:$0xff]  }
  0xc6   :  { %1932 = vmatprep.mubr.bf16.mxu1 %v6051_v37  ;;  %v5197_v37 = vld [vmem:[%s7491_s1 + $0x468] ss:$16 sps:$4 sm:$0xff]  }
  0xc7   :  { %1862 = vmatpush1.bf16.msra.mxu0 %v5185_v28  ;;  %v5283_v28 = vld [vmem:[%s7493_s3 + $0x24] ss:$16 sps:$4 sm:$0xff]  }
  0xc8   :  { %1903 = vmatpush1.bf16.msra.mxu1 %v5188_v47  ;;  %1863 = vmatprep.subr.bf16.mxu0 %v5193_v51  ;;  %v5286_v47 = vld [vmem:[%s7493_s3 + $0x2c] ss:$16 sps:$4 sm:$0xff]   ;;  %v5281_v51 = vld [vmem:[%s7493_s3 + $0x20] ss:$16 sps:$4 sm:$0xff]  }
  0xc9   :  { %1904 = vmatprep.subr.bf16.mxu1 %v5196_v6  ;;  %v5284_v6 = vld [vmem:[%s7493_s3 + $0x28] ss:$16 sps:$4 sm:$0xff]  }
  0xcb   :  { %1864 = vmatpush1.bf16.msra.mxu0 %v5191_v7  ;;  %v5289_v7 = vld [vmem:[%s7493_s3 + $0x44] ss:$16 sps:$4 sm:$0xff]  }
  0xcc   :  { %1905 = vmatpush1.bf16.msra.mxu1 %v5194_v29  ;;  %1865 = vmatprep.subr.bf16.mxu0 %v5199_v30  ;;  %v5290_v29 = vld [vmem:[%s7493_s3 + $0x48] ss:$16 sps:$4 sm:$0xff]   ;;  %v5295_v30 = vld [vmem:[%s7493_s3 + $0x64] ss:$16 sps:$4 sm:$0xff]  }
  0xcd   :  { %1906 = vmatprep.subr.bf16.mxu1 %v5202_v36  ;;  %v5298_v36 = vld [vmem:[%s7493_s3 + $0x6c] ss:$16 sps:$4 sm:$0xff]  }
  0xcf   :  { %1866 = vmatpush1.bf16.msra.mxu0 %v5197_v37  ;;  %v5293_v37 = vld [vmem:[%s7493_s3 + $0x60] ss:$16 sps:$4 sm:$0xff]  }
  0xd0   :  { %1907 = vmatpush1.bf16.msra.mxu1 %v5200_v31  ;;  %1867 = vmatprep.subr.bf16.mxu0 %v5205_v32  ;;  %v5296_v31 = vld [vmem:[%s7493_s3 + $0x68] ss:$16 sps:$4 sm:$0xff]   ;;  %v5301_v32 = vld [vmem:[%s7493_s3 + $0x84] ss:$16 sps:$4 sm:$0xff]  }
  0xd1   :  { %1908 = vmatprep.subr.bf16.mxu1 %v5208_v33  ;;  %v5304_v33 = vld [vmem:[%s7493_s3 + $0x8c] ss:$16 sps:$4 sm:$0xff]  }
  0xd3   :  { %1868 = vmatpush1.bf16.msra.mxu0 %v5203_v34  ;;  %v5299_v34 = vld [vmem:[%s7493_s3 + $0x80] ss:$16 sps:$4 sm:$0xff]  }
  0xd4   :  { %1909 = vmatpush1.bf16.msra.mxu1 %v5206_v35  ;;  %1869 = vmatprep.subr.bf16.mxu0 %v5211_v38  ;;  %v5302_v35 = vld [vmem:[%s7493_s3 + $0x88] ss:$16 sps:$4 sm:$0xff]   ;;  %v5307_v38 = vld [vmem:[%s7493_s3 + $0xa4] ss:$16 sps:$4 sm:$0xff]  }
  0xd5   :  { %1910 = vmatprep.subr.bf16.mxu1 %v5214_v39  ;;  %v5310_v39 = vld [vmem:[%s7493_s3 + $0xac] ss:$16 sps:$4 sm:$0xff]  }
  0xd7   :  { %1870 = vmatpush1.bf16.msra.mxu0 %v5209_v40  ;;  %v5305_v40 = vld [vmem:[%s7493_s3 + $0xa0] ss:$16 sps:$4 sm:$0xff]  }
  0xd8   :  { %1911 = vmatpush1.bf16.msra.mxu1 %v5212_v41  ;;  %1871 = vmatprep.subr.bf16.mxu0 %v5217_v42  ;;  %v5308_v41 = vld [vmem:[%s7493_s3 + $0xa8] ss:$16 sps:$4 sm:$0xff]   ;;  %v5313_v42 = vld [vmem:[%s7493_s3 + $0xc4] ss:$16 sps:$4 sm:$0xff]  }
  0xd9   :  { %1912 = vmatprep.subr.bf16.mxu1 %v5220_v43  ;;  %v5316_v43 = vld [vmem:[%s7493_s3 + $0xcc] ss:$16 sps:$4 sm:$0xff]  }
  0xdb   :  { %1872 = vmatpush1.bf16.msra.mxu0 %v5215_v44 }
  0xdc   :  { %1913 = vmatpush1.bf16.msra.mxu1 %v5218_v45  ;;  %1873 = vmatprep.subr.bf16.mxu0 %v5223_v46 }
  0xdd   :  { %1914 = vmatprep.subr.bf16.mxu1 %v5226_v48 }
  0xdf   :  { %1874 = vmatpush1.bf16.msra.mxu0 %v5221_v49 }
  0xe0   :  { %1915 = vmatpush1.bf16.msra.mxu1 %v5224_v50  ;;  %1875 = vmatprep.subr.bf16.mxu0 %v5229_v52 }
  0xe1   :  { %1916 = vmatprep.subr.bf16.mxu1 %v5232_v53 }
  0xe3   :  { %1876 = vmatpush1.bf16.msra.mxu0 %v5227_v54  ;;  %v5311_v54 = vld [vmem:[%s7493_s3 + $0xc0] ss:$16 sps:$4 sm:$0xff]  }
  0xe4   :  { %1917 = vmatpush1.bf16.msra.mxu1 %v5230_v55  ;;  %1877 = vmatprep.subr.bf16.mxu0 %v5235_v56  ;;  %v5314_v55 = vld [vmem:[%s7493_s3 + $0xc8] ss:$16 sps:$4 sm:$0xff]  }
  0xe5   :  { %1918 = vmatprep.subr.bf16.mxu1 %v5238_v57 }
  0xe7   :  { %1878 = vmatpush1.bf16.msra.mxu0 %v5233_v58  ;;  %v5319_v58 = vld [vmem:[%s7493_s3 + $0xe4] ss:$16 sps:$4 sm:$0xff]  }
  0xe8   :  { %1919 = vmatpush1.bf16.msra.mxu1 %v5236_v59  ;;  %1879 = vmatprep.subr.bf16.mxu0 %v5241_v60  ;;  %v5322_v59 = vld [vmem:[%s7493_s3 + $0xec] ss:$16 sps:$4 sm:$0xff]   ;;  %v5317_v60 = vld [vmem:[%s7493_s3 + $0xe0] ss:$16 sps:$4 sm:$0xff]  }
  0xe9   :  { %1920 = vmatprep.subr.bf16.mxu1 %v5244_v61  ;;  %v5320_v61 = vld [vmem:[%s7493_s3 + $0xe8] ss:$16 sps:$4 sm:$0xff]  }
  0xeb   :  { %1880 = vmatpush1.bf16.msra.mxu0 %v5239_v62  ;;  %v5325_v62 = vld [vmem:[%s7493_s3 + $0x104] ss:$16 sps:$4 sm:$0xff]  }
  0xec   :  { %1921 = vmatpush1.bf16.msra.mxu1 %v5242_v63  ;;  %1881 = vmatprep.subr.bf16.mxu0 %v5247_v0  ;;  %v5328_v63 = vld [vmem:[%s7493_s3 + $0x10c] ss:$16 sps:$4 sm:$0xff]   ;;  %v5323_v0 = vld [vmem:[%s7493_s3 + $0x100] ss:$16 sps:$4 sm:$0xff]  }
  0xed   :  { %1922 = vmatprep.subr.bf16.mxu1 %v5250_v1  ;;  %v5326_v1 = vld [vmem:[%s7493_s3 + $0x108] ss:$16 sps:$4 sm:$0xff]  }
  0xef   :  { %1882 = vmatpush1.bf16.msra.mxu0 %v5245_v2  ;;  %v5331_v2 = vld [vmem:[%s7493_s3 + $0x124] ss:$16 sps:$4 sm:$0xff]  }
  0xf0   :  { %1923 = vmatpush1.bf16.msra.mxu1 %v5248_v3  ;;  %1883 = vmatprep.subr.bf16.mxu0 %v5253_v4  ;;  %v5334_v3 = vld [vmem:[%s7493_s3 + $0x12c] ss:$16 sps:$4 sm:$0xff]   ;;  %v5329_v4 = vld [vmem:[%s7493_s3 + $0x120] ss:$16 sps:$4 sm:$0xff]  }
  0xf1   :  { %1924 = vmatprep.subr.bf16.mxu1 %v5256_v5  ;;  %v5332_v5 = vld [vmem:[%s7493_s3 + $0x128] ss:$16 sps:$4 sm:$0xff]  }
  0xf3   :  { %1884 = vmatpush1.bf16.msra.mxu0 %v5251_v8  ;;  %v5337_v8 = vld [vmem:[%s7493_s3 + $0x144] ss:$16 sps:$4 sm:$0xff]  }
  0xf4   :  { %1925 = vmatpush1.bf16.msra.mxu1 %v5254_v9  ;;  %1885 = vmatprep.subr.bf16.mxu0 %v5259_v10  ;;  %v5340_v9 = vld [vmem:[%s7493_s3 + $0x14c] ss:$16 sps:$4 sm:$0xff]   ;;  %v5335_v10 = vld [vmem:[%s7493_s3 + $0x140] ss:$16 sps:$4 sm:$0xff]  }
  0xf5   :  { %1926 = vmatprep.subr.bf16.mxu1 %v5262_v11  ;;  %v5338_v11 = vld [vmem:[%s7493_s3 + $0x148] ss:$16 sps:$4 sm:$0xff]  }
  0xf7   :  { %1886 = vmatpush1.bf16.msra.mxu0 %v5257_v12  ;;  %v5343_v12 = vld [vmem:[%s7493_s3 + $0x164] ss:$16 sps:$4 sm:$0xff]  }
  0xf8   :  { %1927 = vmatpush1.bf16.msra.mxu1 %v5260_v13  ;;  %1887 = vmatprep.subr.bf16.mxu0 %v5265_v14  ;;  %v5346_v13 = vld [vmem:[%s7493_s3 + $0x16c] ss:$16 sps:$4 sm:$0xff]   ;;  %v5341_v14 = vld [vmem:[%s7493_s3 + $0x160] ss:$16 sps:$4 sm:$0xff]  }
  0xf9   :  { %1928 = vmatprep.subr.bf16.mxu1 %v5268_v15  ;;  %v5344_v15 = vld [vmem:[%s7493_s3 + $0x168] ss:$16 sps:$4 sm:$0xff]  }
  0xfb   :  { %1888 = vmatpush1.bf16.msra.mxu0 %v5263_v18  ;;  %v5349_v18 = vld [vmem:[%s7493_s3 + $0x184] ss:$16 sps:$4 sm:$0xff]  }
  0xfc   :  { %1929 = vmatpush1.bf16.msra.mxu1 %v5266_v19  ;;  %1889 = vmatprep.subr.bf16.mxu0 %v5271_v20  ;;  %v5352_v19 = vld [vmem:[%s7493_s3 + $0x18c] ss:$16 sps:$4 sm:$0xff]   ;;  %v5347_v20 = vld [vmem:[%s7493_s3 + $0x180] ss:$16 sps:$4 sm:$0xff]  }
  0xfd   :  { %1930 = vmatprep.subr.bf16.mxu1 %v5274_v21  ;;  %v5350_v21 = vld [vmem:[%s7493_s3 + $0x188] ss:$16 sps:$4 sm:$0xff]  }
  0xff   :  { %1890 = vmatpush1.bf16.msra.mxu0 %v5269_v22  ;;  %v5355_v22 = vld [vmem:[%s7493_s3 + $0x1a4] ss:$16 sps:$4 sm:$0xff]  }
 0x100   :  { %1931 = vmatpush1.bf16.msra.mxu1 %v5272_v23  ;;  %2780 = vmatprep.subr.bf16.mxu0 %v5277_v24  ;;  %v5358_v23 = vld [vmem:[%s7493_s3 + $0x1ac] ss:$16 sps:$4 sm:$0xff]   ;;  %v5353_v24 = vld [vmem:[%s7493_s3 + $0x1a0] ss:$16 sps:$4 sm:$0xff]  }
 0x101   :  { %2862 = vmatprep.subr.bf16.mxu1 %v5280_v25  ;;  %v5356_v25 = vld [vmem:[%s7493_s3 + $0x1a8] ss:$16 sps:$4 sm:$0xff]  }
 0x102   :  { %1892 = vmatmul.mubr.bf16.vlgmr.msra.gmra.mrb[12].mxu0 %v6171_v16  ;;  %v5292_v16 = vld [vmem:[%s7493_s3 + $0x4c] ss:$16 sps:$4 sm:$0xff]  }
 0x103   :  { %1933 = vmatmul.mubr.bf16.vlgmr.msra.gmra.mrb[12].mxu1 %v6175_v17  ;;  %2781 = vmatpush1.bf16.msra.mxu0 %v5275_v26  ;;  %v5287_v17 = vld [vmem:[%s7493_s3 + $0x40] ss:$16 sps:$4 sm:$0xff]   ;;  %v5361_v26 = vld [vmem:[%s7493_s3 + $0x1c4] ss:$16 sps:$4 sm:$0xff]  }
 0x104   :  { %2863 = vmatpush1.bf16.msra.mxu1 %v5278_v27  ;;  %2782 = vmatprep.subr.bf16.mxu0 %v5283_v28  ;;  %v5364_v27 = vld [vmem:[%s7493_s3 + $0x1cc] ss:$16 sps:$4 sm:$0xff]   ;;  %v5359_v28 = vld [vmem:[%s7493_s3 + $0x1c0] ss:$16 sps:$4 sm:$0xff]  }
 0x105   :  { %2864 = vmatprep.subr.bf16.mxu1 %v5286_v47  ;;  %v5362_v47 = vld [vmem:[%s7493_s3 + $0x1c8] ss:$16 sps:$4 sm:$0xff]  }
 0x107   :  { %2783 = vmatpush1.bf16.msra.mxu0 %v5281_v51  ;;  %v5367_v51 = vld [vmem:[%s7493_s3 + $0x1e4] ss:$16 sps:$4 sm:$0xff]  }
 0x108   :  { %2865 = vmatpush1.bf16.msra.mxu1 %v5284_v6  ;;  %2784 = vmatprep.subr.bf16.mxu0 %v5289_v7  ;;  %v5370_v6 = vld [vmem:[%s7493_s3 + $0x1ec] ss:$16 sps:$4 sm:$0xff]   ;;  %v5365_v7 = vld [vmem:[%s7493_s3 + $0x1e0] ss:$16 sps:$4 sm:$0xff]  }
 0x109   :  { %2866 = vmatprep.subr.bf16.mxu1 %v5292_v16  ;;  %v5368_v16 = vld [vmem:[%s7493_s3 + $0x1e8] ss:$16 sps:$4 sm:$0xff]  }
 0x10b   :  { %2785 = vmatpush1.bf16.msra.mxu0 %v5287_v17  ;;  %v5373_v17 = vld [vmem:[%s7493_s3 + $0x204] ss:$16 sps:$4 sm:$0xff]  }
 0x10c   :  { %2867 = vmatpush1.bf16.msra.mxu1 %v5290_v29  ;;  %2786 = vmatprep.subr.bf16.mxu0 %v5295_v30  ;;  %v5376_v29 = vld [vmem:[%s7493_s3 + $0x20c] ss:$16 sps:$4 sm:$0xff]   ;;  %v1958_v30 = vlaneseq }
 0x10d   :  { %2868 = vmatprep.subr.bf16.mxu1 %v5298_v36 }
 0x10e   :  { %v6767_v36 = vshrl.u32 %v1958_v30, 7  ;;  %v5436_v30 = vld [vmem:[%s7493_s3 + $0x34c] ss:$16 sps:$4 sm:$0xff]  }
 0x10f   :  { %2787 = vmatpush1.bf16.msra.mxu0 %v5293_v37 }
 0x110   :  { %2869 = vmatpush1.bf16.msra.mxu1 %v5296_v31  ;;  %2788 = vmatprep.subr.bf16.mxu0 %v5301_v32  ;;  %v6770_v37 = vsub.s32 0, %v6767_v36  ;;  %v6775_v31 = vld [vmem:[%s7494_s2] sm:$0xf]  ;;  %v6778_v32 = vsub.s32 1, %v6767_v36 }
 0x111   :  { %2870 = vmatprep.subr.bf16.mxu1 %v5304_v33 }
 0x113   :  { %2789 = vmatpush1.bf16.msra.mxu0 %v5299_v34 }
 0x114   :  { %2871 = vmatpush1.bf16.msra.mxu1 %v5302_v35  ;;  %2790 = vmatprep.subr.bf16.mxu0 %v5307_v38  ;;  %v1961_v38 = vrot.slane %v6775_v31, %v6770_v37 }
 0x115   :  { %2872 = vmatprep.subr.bf16.mxu1 %v5310_v39  ;;  %v1647_v44 = vpop.f32.mrb[0].mxu0 }
 0x116   :  { %v1688_v45 = vpop.f32.mrb[0].mxu1  ;;  %v1649_v48 = vpop.f32.mrb[1].mxu0 }
 0x117   :  { %v6643_v46 = vadd.f32 %v1688_v45, %v1647_v44  ;;  %v1690_v49 = vpop.f32.mrb[1].mxu1  ;;  %v1651_v52 = vpop.f32.mrb[2].mxu0  ;;  %2791 = vmatpush1.bf16.msra.mxu0 %v5305_v40 }
 0x118   :  { %v6645_v50 = vadd.f32 %v1690_v49, %v1649_v48  ;;  %v1692_v53 = vpop.f32.mrb[2].mxu1  ;;  %2873 = vmatpush1.bf16.msra.mxu1 %v5308_v41  ;;  %v1652_v56 = vpop.f32.mrb[3].mxu0  ;;  %2792 = vmatprep.subr.bf16.mxu0 %v5313_v42  ;;  %v1965_v42 = vrot.slane %v6775_v31, %v6778_v32 }
 0x119   :  { %v1693_v57 = vpop.f32.mrb[3].mxu1  ;;  %2874 = vmatprep.subr.bf16.mxu1 %v5316_v43 }
 0x11a   :  { %v5371_v57 = vld [vmem:[%s7493_s3 + $0x200] ss:$16 sps:$4 sm:$0xff]  }
 0x11b   :  { %2793 = vmatpush1.bf16.msra.mxu0 %v5311_v54 }
 0x11c   :  { %2875 = vmatpush1.bf16.msra.mxu1 %v5314_v55  ;;  %2794 = vmatprep.subr.bf16.mxu0 %v5319_v58 }
 0x11d   :  { %2876 = vmatprep.subr.bf16.mxu1 %v5322_v59  ;;  %v5379_v59 = vld [vmem:[%s7493_s3 + $0x224] ss:$16 sps:$4 sm:$0xff]  }
 0x11f   :  { %2795 = vmatpush1.bf16.msra.mxu0 %v5317_v60  ;;  %v5382_v60 = vld [vmem:[%s7493_s3 + $0x22c] ss:$16 sps:$4 sm:$0xff]  }
 0x120   :  { %2877 = vmatpush1.bf16.msra.mxu1 %v5320_v61  ;;  %2796 = vmatprep.subr.bf16.mxu0 %v5325_v62  ;;  %v5377_v61 = vld [vmem:[%s7493_s3 + $0x220] ss:$16 sps:$4 sm:$0xff]   ;;  %v5380_v62 = vld [vmem:[%s7493_s3 + $0x228] ss:$16 sps:$4 sm:$0xff]  }
 0x121   :  { %2878 = vmatprep.subr.bf16.mxu1 %v5328_v63  ;;  %v5385_v63 = vld [vmem:[%s7493_s3 + $0x244] ss:$16 sps:$4 sm:$0xff]  }
 0x123   :  { %2797 = vmatpush1.bf16.msra.mxu0 %v5323_v0  ;;  %v5388_v0 = vld [vmem:[%s7493_s3 + $0x24c] ss:$16 sps:$4 sm:$0xff]  }
 0x124   :  { %2879 = vmatpush1.bf16.msra.mxu1 %v5326_v1  ;;  %2798 = vmatprep.subr.bf16.mxu0 %v5331_v2  ;;  %v5383_v1 = vld [vmem:[%s7493_s3 + $0x240] ss:$16 sps:$4 sm:$0xff]   ;;  %v5386_v2 = vld [vmem:[%s7493_s3 + $0x248] ss:$16 sps:$4 sm:$0xff]  }
 0x125   :  { %2880 = vmatprep.subr.bf16.mxu1 %v5334_v3  ;;  %v5391_v3 = vld [vmem:[%s7493_s3 + $0x264] ss:$16 sps:$4 sm:$0xff]  }
 0x127   :  { %2799 = vmatpush1.bf16.msra.mxu0 %v5329_v4  ;;  %v5394_v4 = vld [vmem:[%s7493_s3 + $0x26c] ss:$16 sps:$4 sm:$0xff]  }
 0x128   :  { %2881 = vmatpush1.bf16.msra.mxu1 %v5332_v5  ;;  %2800 = vmatprep.subr.bf16.mxu0 %v5337_v8  ;;  %v5389_v5 = vld [vmem:[%s7493_s3 + $0x260] ss:$16 sps:$4 sm:$0xff]   ;;  %v5392_v8 = vld [vmem:[%s7493_s3 + $0x268] ss:$16 sps:$4 sm:$0xff]  }
 0x129   :  { %2882 = vmatprep.subr.bf16.mxu1 %v5340_v9  ;;  %v5397_v9 = vld [vmem:[%s7493_s3 + $0x284] ss:$16 sps:$4 sm:$0xff]  }
 0x12b   :  { %2801 = vmatpush1.bf16.msra.mxu0 %v5335_v10  ;;  %v5400_v10 = vld [vmem:[%s7493_s3 + $0x28c] ss:$16 sps:$4 sm:$0xff]  }
 0x12c   :  { %2883 = vmatpush1.bf16.msra.mxu1 %v5338_v11  ;;  %2802 = vmatprep.subr.bf16.mxu0 %v5343_v12  ;;  %v5395_v11 = vld [vmem:[%s7493_s3 + $0x280] ss:$16 sps:$4 sm:$0xff]   ;;  %v5398_v12 = vld [vmem:[%s7493_s3 + $0x288] ss:$16 sps:$4 sm:$0xff]  }
 0x12d   :  { %2884 = vmatprep.subr.bf16.mxu1 %v5346_v13  ;;  %v5403_v13 = vld [vmem:[%s7493_s3 + $0x2a4] ss:$16 sps:$4 sm:$0xff]  }
 0x12f   :  { %2803 = vmatpush1.bf16.msra.mxu0 %v5341_v14  ;;  %v5406_v14 = vld [vmem:[%s7493_s3 + $0x2ac] ss:$16 sps:$4 sm:$0xff]  }
 0x130   :  { %2885 = vmatpush1.bf16.msra.mxu1 %v5344_v15  ;;  %2804 = vmatprep.subr.bf16.mxu0 %v5349_v18  ;;  %v5401_v15 = vld [vmem:[%s7493_s3 + $0x2a0] ss:$16 sps:$4 sm:$0xff]   ;;  %v5404_v18 = vld [vmem:[%s7493_s3 + $0x2a8] ss:$16 sps:$4 sm:$0xff]  }
 0x131   :  { %2886 = vmatprep.subr.bf16.mxu1 %v5352_v19  ;;  %v5409_v19 = vld [vmem:[%s7493_s3 + $0x2c4] ss:$16 sps:$4 sm:$0xff]  }
 0x133   :  { %2805 = vmatpush1.bf16.msra.mxu0 %v5347_v20  ;;  %v5412_v20 = vld [vmem:[%s7493_s3 + $0x2cc] ss:$16 sps:$4 sm:$0xff]  }
 0x134   :  { %2887 = vmatpush1.bf16.msra.mxu1 %v5350_v21  ;;  %2806 = vmatprep.subr.bf16.mxu0 %v5355_v22  ;;  %v5407_v21 = vld [vmem:[%s7493_s3 + $0x2c0] ss:$16 sps:$4 sm:$0xff]   ;;  %v5410_v22 = vld [vmem:[%s7493_s3 + $0x2c8] ss:$16 sps:$4 sm:$0xff]  }
 0x135   :  { %2888 = vmatprep.subr.bf16.mxu1 %v5358_v23  ;;  %v5415_v23 = vld [vmem:[%s7493_s3 + $0x2e4] ss:$16 sps:$4 sm:$0xff]  }
 0x137   :  { %2807 = vmatpush1.bf16.msra.mxu0 %v5353_v24  ;;  %v5418_v24 = vld [vmem:[%s7493_s3 + $0x2ec] ss:$16 sps:$4 sm:$0xff]  }
 0x138   :  { %2889 = vmatpush1.bf16.msra.mxu1 %v5356_v25  ;;  %2808 = vmatprep.subr.bf16.mxu0 %v5361_v26  ;;  %v5413_v25 = vld [vmem:[%s7493_s3 + $0x2e0] ss:$16 sps:$4 sm:$0xff]   ;;  %v5416_v26 = vld [vmem:[%s7493_s3 + $0x2e8] ss:$16 sps:$4 sm:$0xff]  }
 0x139   :  { %2890 = vmatprep.subr.bf16.mxu1 %v5364_v27  ;;  %v5421_v27 = vld [vmem:[%s7493_s3 + $0x304] ss:$16 sps:$4 sm:$0xff]  }
 0x13b   :  { %2809 = vmatpush1.bf16.msra.mxu0 %v5359_v28  ;;  %v5424_v28 = vld [vmem:[%s7493_s3 + $0x30c] ss:$16 sps:$4 sm:$0xff]  }
 0x13c   :  { %2891 = vmatpush1.bf16.msra.mxu1 %v5362_v47  ;;  %2810 = vmatprep.subr.bf16.mxu0 %v5367_v51  ;;  %v5419_v47 = vld [vmem:[%s7493_s3 + $0x300] ss:$16 sps:$4 sm:$0xff]   ;;  %v5422_v51 = vld [vmem:[%s7493_s3 + $0x308] ss:$16 sps:$4 sm:$0xff]  }
 0x13d   :  { %2892 = vmatprep.subr.bf16.mxu1 %v5370_v6  ;;  %v5427_v6 = vld [vmem:[%s7493_s3 + $0x324] ss:$16 sps:$4 sm:$0xff]  }
 0x13f   :  { %2811 = vmatpush1.bf16.msra.mxu0 %v5365_v7  ;;  %v5430_v7 = vld [vmem:[%s7493_s3 + $0x32c] ss:$16 sps:$4 sm:$0xff]  }
 0x140   :  { %2893 = vmatpush1.bf16.msra.mxu1 %v5368_v16  ;;  %2821 = vmatprep.subr.bf16.mxu0 %v5373_v17  ;;  %v5425_v16 = vld [vmem:[%s7493_s3 + $0x320] ss:$16 sps:$4 sm:$0xff]   ;;  %v5428_v17 = vld [vmem:[%s7493_s3 + $0x328] ss:$16 sps:$4 sm:$0xff]  }
 0x141   :  { %2903 = vmatprep.subr.bf16.mxu1 %v5376_v29  ;;  %v5433_v29 = vld [vmem:[%s7493_s3 + $0x344] ss:$16 sps:$4 sm:$0xff]  }
 0x155   :  { %v1729_v33 = vpop.f32.mrb[4].mxu0 }
 0x156   :  { %v1770_v34 = vpop.f32.mrb[4].mxu1  ;;  %v1730_v35 = vadd.f32 %v1729_v33, %v6643_v46  ;;  %v1731_v39 = vpop.f32.mrb[5].mxu0  ;;  %v5431_v33 = vld [vmem:[%s7493_s3 + $0x340] ss:$16 sps:$4 sm:$0xff]  }
 0x157   :  { %v1772_v40 = vpop.f32.mrb[5].mxu1  ;;  %v1732_v41 = vadd.f32 %v1731_v39, %v6645_v50  ;;  %v1733_v43 = vpop.f32.mrb[6].mxu0  ;;  %v5374_v50 = vld [vmem:[%s7493_s3 + $0x208] ss:$16 sps:$4 sm:$0xff]   ;;  %v5437_v39 = vld [vmem:[%s7493_s3 + $0x360] ss:$16 sps:$4 sm:$0xff]  }
 0x158   :  { %v1774_v44 = vpop.f32.mrb[6].mxu1  ;;  %v1771_v45 = vadd.f32 %v1770_v34, %v1730_v35  ;;  %v1734_v48 = vpop.f32.mrb[7].mxu0  ;;  %v5434_v34 = vld [vmem:[%s7493_s3 + $0x348] ss:$16 sps:$4 sm:$0xff]   ;;  %v5439_v35 = vld [vmem:[%s7493_s3 + $0x364] ss:$16 sps:$4 sm:$0xff]  }
 0x159   :  { %v1775_v49 = vpop.f32.mrb[7].mxu1  ;;  %v1773_v52 = vadd.f32 %v1772_v40, %v1732_v41  ;;  %v5440_v40 = vld [vmem:[%s7493_s3 + $0x368] ss:$16 sps:$4 sm:$0xff]   ;;  %v5445_v41 = vld [vmem:[%s7493_s3 + $0x384] ss:$16 sps:$4 sm:$0xff]  }
 0x15a   :  { %v1978_v53 = vadd.f32 %v1961_v38, %v1771_v45  ;;  %v5442_v38 = vld [vmem:[%s7493_s3 + $0x36c] ss:$16 sps:$4 sm:$0xff]   ;;  %v5443_v43 = vld [vmem:[%s7493_s3 + $0x380] ss:$16 sps:$4 sm:$0xff]   ;;  %v5446_v44 = vld [vmem:[%s7493_s3 + $0x388] ss:$16 sps:$4 sm:$0xff]  }
 0x15b   :  { %v1979_v54 = vadd.f32 %v1965_v42, %v1773_v52  ;;  %v5448_v42 = vld [vmem:[%s7493_s3 + $0x38c] ss:$16 sps:$4 sm:$0xff]   ;;  %v5451_v45 = vld [vmem:[%s7493_s3 + $0x3a4] ss:$16 sps:$4 sm:$0xff]   ;;  %v5449_v49 = vld [vmem:[%s7493_s3 + $0x3a0] ss:$16 sps:$4 sm:$0xff]  }
 0x15c   :  { %v1982_v55 = vmax.f32 %v1978_v53, 0.0  ;;  %v5454_v48 = vld [vmem:[%s7493_s3 + $0x3ac] ss:$16 sps:$4 sm:$0xff]   ;;  %v5452_v52 = vld [vmem:[%s7493_s3 + $0x3a8] ss:$16 sps:$4 sm:$0xff]  }
 0x15d   :  { %v1983_v46 = vmax.f32 %v1979_v54, 0.0  ;;  %v5457_v53 = vld [vmem:[%s7493_s3 + $0x3c4] ss:$16 sps:$4 sm:$0xff]   ;;  %v5460_v54 = vld [vmem:[%s7493_s3 + $0x3cc] ss:$16 sps:$4 sm:$0xff]  }
 0x15e   :  { %v1986_v58 = vpack.c.bf16 %v1982_v55, %v1982_v55 }
 0x15f   :  { %v1987_v56 = vpack.c.bf16 %v1983_v46, %v1983_v46 }
 0x161   :  { %2812 = vmatprep.mubr.bf16.mxu0 %v1987_v56  ;;  %2894 = vmatprep.mubr.bf16.mxu1 %v1987_v56  ;;  %v5455_v56 = vld [vmem:[%s7493_s3 + $0x3c0] ss:$16 sps:$4 sm:$0xff]  }
 0x162   :  { %2813 = vmatmul.mubr.bf16.vlgmr.msra.gmra.mrb[16].mxu0 %v1986_v58  ;;  %2895 = vmatmul.mubr.bf16.vlgmr.msra.gmra.mrb[16].mxu1 %v1986_v58 }
 0x163   :  { %2822 = vmatpush1.bf16.msra.mxu0 %v5371_v57  ;;  %2904 = vmatpush1.bf16.msra.mxu1 %v5374_v50  ;;  %v5458_v57 = vld [vmem:[%s7493_s3 + $0x3c8] ss:$16 sps:$4 sm:$0xff]  }
 0x164   :  { %2823 = vmatprep.subr.bf16.mxu0 %v5379_v59  ;;  %2905 = vmatprep.subr.bf16.mxu1 %v5382_v60  ;;  %v5463_v60 = vld [vmem:[%s7493_s3 + $0x3e4] ss:$16 sps:$4 sm:$0xff]  }
 0x167   :  { %2824 = vmatpush1.bf16.msra.mxu0 %v5377_v61  ;;  %2906 = vmatpush1.bf16.msra.mxu1 %v5380_v62 }
 0x168   :  { %2825 = vmatprep.subr.bf16.mxu0 %v5385_v63  ;;  %2907 = vmatprep.subr.bf16.mxu1 %v5388_v0 }
 0x16b   :  { %2826 = vmatpush1.bf16.msra.mxu0 %v5383_v1  ;;  %2908 = vmatpush1.bf16.msra.mxu1 %v5386_v2  ;;  %v5466_v2 = vld [vmem:[%s7493_s3 + $0x3ec] ss:$16 sps:$4 sm:$0xff]  }
 0x16c   :  { %2827 = vmatprep.subr.bf16.mxu0 %v5391_v3  ;;  %2909 = vmatprep.subr.bf16.mxu1 %v5394_v4  ;;  %v5461_v3 = vld [vmem:[%s7493_s3 + $0x3e0] ss:$16 sps:$4 sm:$0xff]   ;;  %v5464_v4 = vld [vmem:[%s7493_s3 + $0x3e8] ss:$16 sps:$4 sm:$0xff]  }
 0x16f   :  { %2828 = vmatpush1.bf16.msra.mxu0 %v5389_v5  ;;  %2910 = vmatpush1.bf16.msra.mxu1 %v5392_v8  ;;  %v5469_v5 = vld [vmem:[%s7495_s5 + $0x4] ss:$16 sps:$4 sm:$0xff]   ;;  %v5472_v8 = vld [vmem:[%s7495_s5 + $0xc] ss:$16 sps:$4 sm:$0xff]  }
 0x170   :  { %2829 = vmatprep.subr.bf16.mxu0 %v5397_v9  ;;  %2911 = vmatprep.subr.bf16.mxu1 %v5400_v10  ;;  %v6979_v9 = vsub.s32 2, %v6767_v36  ;;  %v6982_v10 = vsub.s32 3, %v6767_v36 }
 0x173   :  { %2830 = vmatpush1.bf16.msra.mxu0 %v5395_v11  ;;  %2912 = vmatpush1.bf16.msra.mxu1 %v5398_v12 }
 0x174   :  { %2831 = vmatprep.subr.bf16.mxu0 %v5403_v13  ;;  %2913 = vmatprep.subr.bf16.mxu1 %v5406_v14  ;;  %v1969_v14 = vrot.slane %v6775_v31, %v6979_v9 }
 0x177   :  { %2832 = vmatpush1.bf16.msra.mxu0 %v5401_v15  ;;  %2914 = vmatpush1.bf16.msra.mxu1 %v5404_v18 }
 0x178   :  { %2833 = vmatprep.subr.bf16.mxu0 %v5409_v19  ;;  %2915 = vmatprep.subr.bf16.mxu1 %v5412_v20  ;;  %v1973_v20 = vrot.slane %v6775_v31, %v6982_v10 }
 0x17b   :  { %2834 = vmatpush1.bf16.msra.mxu0 %v5407_v21  ;;  %2916 = vmatpush1.bf16.msra.mxu1 %v5410_v22 }
 0x17c   :  { %2835 = vmatprep.subr.bf16.mxu0 %v5415_v23  ;;  %2917 = vmatprep.subr.bf16.mxu1 %v5418_v24 }
 0x17f   :  { %2836 = vmatpush1.bf16.msra.mxu0 %v5413_v25  ;;  %2918 = vmatpush1.bf16.msra.mxu1 %v5416_v26 }
 0x180   :  { %2837 = vmatprep.subr.bf16.mxu0 %v5421_v27  ;;  %2919 = vmatprep.subr.bf16.mxu1 %v5424_v28 }
 0x183   :  { %2838 = vmatpush1.bf16.msra.mxu0 %v5419_v47  ;;  %2920 = vmatpush1.bf16.msra.mxu1 %v5422_v51 }
 0x184   :  { %2839 = vmatprep.subr.bf16.mxu0 %v5427_v6  ;;  %2921 = vmatprep.subr.bf16.mxu1 %v5430_v7  ;;  %v5467_v6 = vld [vmem:[%s7495_s5] ss:$16 sps:$4 sm:$0xff]   ;;  %v5470_v7 = vld [vmem:[%s7495_s5 + $0x8] ss:$16 sps:$4 sm:$0xff]  }
 0x187   :  { %2840 = vmatpush1.bf16.msra.mxu0 %v5425_v16  ;;  %2922 = vmatpush1.bf16.msra.mxu1 %v5428_v17  ;;  %v5475_v16 = vld [vmem:[%s7495_s5 + $0x24] ss:$16 sps:$4 sm:$0xff]   ;;  %v5478_v17 = vld [vmem:[%s7495_s5 + $0x2c] ss:$16 sps:$4 sm:$0xff]  }
 0x188   :  { %2841 = vmatprep.subr.bf16.mxu0 %v5433_v29  ;;  %2923 = vmatprep.subr.bf16.mxu1 %v5436_v30  ;;  %v5473_v29 = vld [vmem:[%s7495_s5 + $0x20] ss:$16 sps:$4 sm:$0xff]   ;;  %v5476_v30 = vld [vmem:[%s7495_s5 + $0x28] ss:$16 sps:$4 sm:$0xff]  }
 0x18b   :  { %2842 = vmatpush1.bf16.msra.mxu0 %v5431_v33  ;;  %2924 = vmatpush1.bf16.msra.mxu1 %v5434_v34  ;;  %v5481_v33 = vld [vmem:[%s7495_s5 + $0x44] ss:$16 sps:$4 sm:$0xff]   ;;  %v5484_v34 = vld [vmem:[%s7495_s5 + $0x4c] ss:$16 sps:$4 sm:$0xff]  }
 0x18c   :  { %2843 = vmatprep.subr.bf16.mxu0 %v5439_v35  ;;  %2925 = vmatprep.subr.bf16.mxu1 %v5442_v38  ;;  %v5479_v35 = vld [vmem:[%s7495_s5 + $0x40] ss:$16 sps:$4 sm:$0xff]   ;;  %v5482_v38 = vld [vmem:[%s7495_s5 + $0x48] ss:$16 sps:$4 sm:$0xff]  }
 0x18f   :  { %2844 = vmatpush1.bf16.msra.mxu0 %v5437_v39  ;;  %2926 = vmatpush1.bf16.msra.mxu1 %v5440_v40  ;;  %v5487_v39 = vld [vmem:[%s7495_s5 + $0x64] ss:$16 sps:$4 sm:$0xff]   ;;  %v5490_v40 = vld [vmem:[%s7495_s5 + $0x6c] ss:$16 sps:$4 sm:$0xff]  }
 0x190   :  { %2845 = vmatprep.subr.bf16.mxu0 %v5445_v41  ;;  %2927 = vmatprep.subr.bf16.mxu1 %v5448_v42  ;;  %v5485_v41 = vld [vmem:[%s7495_s5 + $0x60] ss:$16 sps:$4 sm:$0xff]   ;;  %v5488_v42 = vld [vmem:[%s7495_s5 + $0x68] ss:$16 sps:$4 sm:$0xff]  }
 0x193   :  { %2846 = vmatpush1.bf16.msra.mxu0 %v5443_v43  ;;  %2928 = vmatpush1.bf16.msra.mxu1 %v5446_v44  ;;  %v5493_v43 = vld [vmem:[%s7495_s5 + $0x84] ss:$16 sps:$4 sm:$0xff]   ;;  %v5496_v44 = vld [vmem:[%s7495_s5 + $0x8c] ss:$16 sps:$4 sm:$0xff]  }
 0x194   :  { %2847 = vmatprep.subr.bf16.mxu0 %v5451_v45  ;;  %2929 = vmatprep.subr.bf16.mxu1 %v5454_v48  ;;  %v5491_v45 = vld [vmem:[%s7495_s5 + $0x80] ss:$16 sps:$4 sm:$0xff]   ;;  %v5494_v48 = vld [vmem:[%s7495_s5 + $0x88] ss:$16 sps:$4 sm:$0xff]  }
 0x195   :  { %v1811_v55 = vpop.f32.mrb[8].mxu0 }
 0x196   :  { %v1852_v46 = vpop.f32.mrb[8].mxu1  ;;  %v1813_v58 = vpop.f32.mrb[9].mxu0 }
 0x197   :  { %v1853_v50 = vadd.f32 %v1852_v46, %v1811_v55  ;;  %v1854_v59 = vpop.f32.mrb[9].mxu1  ;;  %v1815_v62 = vpop.f32.mrb[10].mxu0  ;;  %2848 = vmatpush1.bf16.msra.mxu0 %v5449_v49  ;;  %2930 = vmatpush1.bf16.msra.mxu1 %v5452_v52  ;;  %v5499_v49 = vld [vmem:[%s7495_s5 + $0xa4] ss:$16 sps:$4 sm:$0xff]   ;;  %v5502_v52 = vld [vmem:[%s7495_s5 + $0xac] ss:$16 sps:$4 sm:$0xff]  }
 0x198   :  { %v1855_v61 = vadd.f32 %v1854_v59, %v1813_v58  ;;  %v1856_v63 = vpop.f32.mrb[10].mxu1  ;;  %v1816_v0 = vpop.f32.mrb[11].mxu0  ;;  %2849 = vmatprep.subr.bf16.mxu0 %v5457_v53  ;;  %2931 = vmatprep.subr.bf16.mxu1 %v5460_v54  ;;  %v5497_v53 = vld [vmem:[%s7495_s5 + $0xa0] ss:$16 sps:$4 sm:$0xff]   ;;  %v5500_v54 = vld [vmem:[%s7495_s5 + $0xa8] ss:$16 sps:$4 sm:$0xff]  }
 0x199   :  { %v1857_v1 = vpop.f32.mrb[11].mxu1  ;;  %v5505_v55 = vld [vmem:[%s7495_s5 + $0xc4] ss:$16 sps:$4 sm:$0xff]   ;;  %v5508_v46 = vld [vmem:[%s7495_s5 + $0xcc] ss:$16 sps:$4 sm:$0xff]  }
 0x19a   :  { %v5514_v58 = vld [vmem:[%s7495_s5 + $0xec] ss:$16 sps:$4 sm:$0xff]   ;;  %v5509_v59 = vld [vmem:[%s7495_s5 + $0xe0] ss:$16 sps:$4 sm:$0xff]   ;;  %v5518_v0 = vld [vmem:[%s7495_s5 + $0x108] ss:$16 sps:$4 sm:$0xff]  }
 0x19b   :  { %2850 = vmatpush1.bf16.msra.mxu0 %v5455_v56  ;;  %2932 = vmatpush1.bf16.msra.mxu1 %v5458_v57  ;;  %v5503_v56 = vld [vmem:[%s7495_s5 + $0xc0] ss:$16 sps:$4 sm:$0xff]   ;;  %v5506_v57 = vld [vmem:[%s7495_s5 + $0xc8] ss:$16 sps:$4 sm:$0xff]   ;;  %v5520_v62 = vld [vmem:[%s7495_s5 + $0x10c] ss:$16 sps:$4 sm:$0xff]  }
 0x19c   :  { %2851 = vmatprep.subr.bf16.mxu0 %v5463_v60  ;;  %2933 = vmatprep.subr.bf16.mxu1 %v5466_v2  ;;  %v5512_v60 = vld [vmem:[%s7495_s5 + $0xe8] ss:$16 sps:$4 sm:$0xff]   ;;  %v5515_v63 = vld [vmem:[%s7495_s5 + $0x100] ss:$16 sps:$4 sm:$0xff]   ;;  %v5523_v1 = vld [vmem:[%s7495_s5 + $0x124] ss:$16 sps:$4 sm:$0xff]  }
 0x19d   :  { %v5526_v2 = vld [vmem:[%s7495_s5 + $0x12c] ss:$16 sps:$4 sm:$0xff]  }
 0x19f   :  { %2852 = vmatpush1.bf16.msra.mxu0 %v5461_v3  ;;  %2934 = vmatpush1.bf16.msra.mxu1 %v5464_v4  ;;  %v5521_v3 = vld [vmem:[%s7495_s5 + $0x120] ss:$16 sps:$4 sm:$0xff]   ;;  %v5524_v4 = vld [vmem:[%s7495_s5 + $0x128] ss:$16 sps:$4 sm:$0xff]  }
 0x1a0   :  { %3742 = vmatprep.subr.bf16.mxu0 %v5469_v5  ;;  %3824 = vmatprep.subr.bf16.mxu1 %v5472_v8  ;;  %v5529_v5 = vld [vmem:[%s7495_s5 + $0x144] ss:$16 sps:$4 sm:$0xff]   ;;  %v5532_v8 = vld [vmem:[%s7495_s5 + $0x14c] ss:$16 sps:$4 sm:$0xff]  }
 0x1d5   :  { %v1893_v11 = vpop.f32.mrb[12].mxu0 }
 0x1d6   :  { %v1934_v12 = vpop.f32.mrb[12].mxu1  ;;  %v1894_v13 = vadd.f32 %v1893_v11, %v1853_v50  ;;  %v1895_v15 = vpop.f32.mrb[13].mxu0  ;;  %v5511_v50 = vld [vmem:[%s7495_s5 + $0xe4] ss:$16 sps:$4 sm:$0xff]   ;;  %v5527_v11 = vld [vmem:[%s7495_s5 + $0x140] ss:$16 sps:$4 sm:$0xff]  }
 0x1d7   :  { %v1936_v18 = vpop.f32.mrb[13].mxu1  ;;  %v1896_v19 = vadd.f32 %v1895_v15, %v1855_v61  ;;  %v1897_v21 = vpop.f32.mrb[14].mxu0  ;;  %v5517_v61 = vld [vmem:[%s7495_s5 + $0x104] ss:$16 sps:$4 sm:$0xff]   ;;  %v5533_v15 = vld [vmem:[%s7495_s5 + $0x160] ss:$16 sps:$4 sm:$0xff]  }
 0x1d8   :  { %v1938_v22 = vpop.f32.mrb[14].mxu1  ;;  %v1935_v23 = vadd.f32 %v1934_v12, %v1894_v13  ;;  %v1898_v24 = vpop.f32.mrb[15].mxu0  ;;  %v5530_v12 = vld [vmem:[%s7495_s5 + $0x148] ss:$16 sps:$4 sm:$0xff]   ;;  %v5535_v13 = vld [vmem:[%s7495_s5 + $0x164] ss:$16 sps:$4 sm:$0xff]  }
 0x1d9   :  { %v1939_v25 = vpop.f32.mrb[15].mxu1  ;;  %v1937_v26 = vadd.f32 %v1936_v18, %v1896_v19  ;;  %v5536_v18 = vld [vmem:[%s7495_s5 + $0x168] ss:$16 sps:$4 sm:$0xff]   ;;  %v5541_v19 = vld [vmem:[%s7495_s5 + $0x184] ss:$16 sps:$4 sm:$0xff]  }
 0x1da   :  { %v1980_v36 = vadd.f32 %v1969_v14, %v1935_v23  ;;  %v5538_v14 = vld [vmem:[%s7495_s5 + $0x16c] ss:$16 sps:$4 sm:$0xff]   ;;  %v5539_v21 = vld [vmem:[%s7495_s5 + $0x180] ss:$16 sps:$4 sm:$0xff]   ;;  %v5542_v22 = vld [vmem:[%s7495_s5 + $0x188] ss:$16 sps:$4 sm:$0xff]  }
 0x1db   :  { %v1981_v27 = vadd.f32 %v1973_v20, %v1937_v26  ;;  %v5544_v20 = vld [vmem:[%s7495_s5 + $0x18c] ss:$16 sps:$4 sm:$0xff]   ;;  %v5547_v23 = vld [vmem:[%s7495_s5 + $0x1a4] ss:$16 sps:$4 sm:$0xff]   ;;  %v5545_v25 = vld [vmem:[%s7495_s5 + $0x1a0] ss:$16 sps:$4 sm:$0xff]  }
 0x1dc   :  { %v1984_v28 = vmax.f32 %v1980_v36, 0.0  ;;  %v5550_v24 = vld [vmem:[%s7495_s5 + $0x1ac] ss:$16 sps:$4 sm:$0xff]   ;;  %v5548_v26 = vld [vmem:[%s7495_s5 + $0x1a8] ss:$16 sps:$4 sm:$0xff]  }
 0x1dd   :  { %v1985_v47 = vmax.f32 %v1981_v27, 0.0  ;;  %v5553_v36 = vld [vmem:[%s7495_s5 + $0x1c4] ss:$16 sps:$4 sm:$0xff]   ;;  %v5556_v27 = vld [vmem:[%s7495_s5 + $0x1cc] ss:$16 sps:$4 sm:$0xff]  }
 0x1de   :  { %v1988_v31 = vpack.c.bf16 %v1984_v28, %v1984_v28  ;;  %v5551_v28 = vld [vmem:[%s7495_s5 + $0x1c0] ss:$16 sps:$4 sm:$0xff]  }
 0x1df   :  { %v1989_v51 = vpack.c.bf16 %v1985_v47, %v1985_v47  ;;  %v5554_v47 = vld [vmem:[%s7495_s5 + $0x1c8] ss:$16 sps:$4 sm:$0xff]  }
 0x1e1   :  { %2853 = vmatprep.mubr.bf16.mxu0 %v1989_v51  ;;  %2935 = vmatprep.mubr.bf16.mxu1 %v1989_v51  ;;  %v5559_v51 = vld [vmem:[%s7495_s5 + $0x1e4] ss:$16 sps:$4 sm:$0xff]  }
 0x1e2   :  { %2854 = vmatmul.mubr.bf16.vlgmr.msra.gmra.mrb[16].mxu0 %v1988_v31  ;;  %2936 = vmatmul.mubr.bf16.vlgmr.msra.gmra.mrb[16].mxu1 %v1988_v31  ;;  %v5560_v31 = vld [vmem:[%s7495_s5 + $0x1e8] ss:$16 sps:$4 sm:$0xff]  }
 0x1e3   :  { %3743 = vmatpush1.bf16.msra.mxu0 %v5467_v6  ;;  %3825 = vmatpush1.bf16.msra.mxu1 %v5470_v7  ;;  %v5562_v6 = vld [vmem:[%s7495_s5 + $0x1ec] ss:$16 sps:$4 sm:$0xff]   ;;  %v5557_v7 = vld [vmem:[%s7495_s5 + $0x1e0] ss:$16 sps:$4 sm:$0xff]  }
 0x1e4   :  { %3744 = vmatprep.subr.bf16.mxu0 %v5475_v16  ;;  %3826 = vmatprep.subr.bf16.mxu1 %v5478_v17  ;;  %v5565_v16 = vld [vmem:[%s7495_s5 + $0x204] ss:$16 sps:$4 sm:$0xff]   ;;  %v5568_v17 = vld [vmem:[%s7495_s5 + $0x20c] ss:$16 sps:$4 sm:$0xff]  }
 0x1e7   :  { %3745 = vmatpush1.bf16.msra.mxu0 %v5473_v29  ;;  %3827 = vmatpush1.bf16.msra.mxu1 %v5476_v30  ;;  %v7183_v29 = vld [vmem:[%s7497_s4] sm:$0xf] }
 0x1e8   :  { %3746 = vmatprep.subr.bf16.mxu0 %v5481_v33  ;;  %3828 = vmatprep.subr.bf16.mxu1 %v5484_v34  ;;  %v2123_v30 = vrot.slane %v7183_v29, %v6770_v37  ;;  %v2127_v33 = vrot.slane %v7183_v29, %v6778_v32  ;;  %v2135_v34 = vrot.slane %v7183_v29, %v6982_v10 }
 0x1eb   :  { %3747 = vmatpush1.bf16.msra.mxu0 %v5479_v35  ;;  %3829 = vmatpush1.bf16.msra.mxu1 %v5482_v38 }
 0x1ec   :  { %3748 = vmatprep.subr.bf16.mxu0 %v5487_v39  ;;  %3830 = vmatprep.subr.bf16.mxu1 %v5490_v40 }
 0x1ef   :  { %3749 = vmatpush1.bf16.msra.mxu0 %v5485_v41  ;;  %3831 = vmatpush1.bf16.msra.mxu1 %v5488_v42 }
 0x1f0   :  { %3750 = vmatprep.subr.bf16.mxu0 %v5493_v43  ;;  %3832 = vmatprep.subr.bf16.mxu1 %v5496_v44 }
 0x1f3   :  { %3751 = vmatpush1.bf16.msra.mxu0 %v5491_v45  ;;  %3833 = vmatpush1.bf16.msra.mxu1 %v5494_v48 }
 0x1f4   :  { %3752 = vmatprep.subr.bf16.mxu0 %v5499_v49  ;;  %3834 = vmatprep.subr.bf16.mxu1 %v5502_v52 }
 0x1f7   :  { %3753 = vmatpush1.bf16.msra.mxu0 %v5497_v53  ;;  %3835 = vmatpush1.bf16.msra.mxu1 %v5500_v54 }
 0x1f8   :  { %3754 = vmatprep.subr.bf16.mxu0 %v5505_v55  ;;  %3836 = vmatprep.subr.bf16.mxu1 %v5508_v46  ;;  %v5563_v46 = vld [vmem:[%s7495_s5 + $0x200] ss:$16 sps:$4 sm:$0xff]  }
 0x1fb   :  { %3755 = vmatpush1.bf16.msra.mxu0 %v5503_v56  ;;  %3837 = vmatpush1.bf16.msra.mxu1 %v5506_v57  ;;  %v5566_v56 = vld [vmem:[%s7495_s5 + $0x208] ss:$16 sps:$4 sm:$0xff]  }
 0x1fc   :  { %3756 = vmatprep.subr.bf16.mxu0 %v5511_v50  ;;  %3838 = vmatprep.subr.bf16.mxu1 %v5514_v58  ;;  %v5571_v50 = vld [vmem:[%s7495_s5 + $0x224] ss:$16 sps:$4 sm:$0xff]   ;;  %v5574_v58 = vld [vmem:[%s7495_s5 + $0x22c] ss:$16 sps:$4 sm:$0xff]  }
 0x1ff   :  { %3757 = vmatpush1.bf16.msra.mxu0 %v5509_v59  ;;  %3839 = vmatpush1.bf16.msra.mxu1 %v5512_v60  ;;  %v5569_v60 = vld [vmem:[%s7495_s5 + $0x220] ss:$16 sps:$4 sm:$0xff]  }
 0x200   :  { %3758 = vmatprep.subr.bf16.mxu0 %v5517_v61  ;;  %3840 = vmatprep.subr.bf16.mxu1 %v5520_v62  ;;  %v5572_v61 = vld [vmem:[%s7495_s5 + $0x228] ss:$16 sps:$4 sm:$0xff]   ;;  %v5577_v62 = vld [vmem:[%s7495_s5 + $0x244] ss:$16 sps:$4 sm:$0xff]  }
 0x203   :  { %3759 = vmatpush1.bf16.msra.mxu0 %v5515_v63  ;;  %3841 = vmatpush1.bf16.msra.mxu1 %v5518_v0  ;;  %v5580_v63 = vld [vmem:[%s7495_s5 + $0x24c] ss:$16 sps:$4 sm:$0xff]   ;;  %v5575_v0 = vld [vmem:[%s7495_s5 + $0x240] ss:$16 sps:$4 sm:$0xff]  }
 0x204   :  { %3760 = vmatprep.subr.bf16.mxu0 %v5523_v1  ;;  %3842 = vmatprep.subr.bf16.mxu1 %v5526_v2  ;;  %v5578_v1 = vld [vmem:[%s7495_s5 + $0x248] ss:$16 sps:$4 sm:$0xff]   ;;  %v5583_v2 = vld [vmem:[%s7495_s5 + $0x264] ss:$16 sps:$4 sm:$0xff]  }
 0x207   :  { %3761 = vmatpush1.bf16.msra.mxu0 %v5521_v3  ;;  %3843 = vmatpush1.bf16.msra.mxu1 %v5524_v4  ;;  %v5586_v3 = vld [vmem:[%s7495_s5 + $0x26c] ss:$16 sps:$4 sm:$0xff]   ;;  %v5581_v4 = vld [vmem:[%s7495_s5 + $0x260] ss:$16 sps:$4 sm:$0xff]  }
 0x208   :  { %3762 = vmatprep.subr.bf16.mxu0 %v5529_v5  ;;  %3844 = vmatprep.subr.bf16.mxu1 %v5532_v8  ;;  %v5584_v5 = vld [vmem:[%s7495_s5 + $0x268] ss:$16 sps:$4 sm:$0xff]   ;;  %v5589_v8 = vld [vmem:[%s7495_s5 + $0x284] ss:$16 sps:$4 sm:$0xff]  }
 0x20b   :  { %3763 = vmatpush1.bf16.msra.mxu0 %v5527_v11  ;;  %3845 = vmatpush1.bf16.msra.mxu1 %v5530_v12  ;;  %v5592_v11 = vld [vmem:[%s7495_s5 + $0x28c] ss:$16 sps:$4 sm:$0xff]   ;;  %v5587_v12 = vld [vmem:[%s7495_s5 + $0x280] ss:$16 sps:$4 sm:$0xff]  }
 0x20c   :  { %3764 = vmatprep.subr.bf16.mxu0 %v5535_v13  ;;  %3846 = vmatprep.subr.bf16.mxu1 %v5538_v14  ;;  %v5590_v13 = vld [vmem:[%s7495_s5 + $0x288] ss:$16 sps:$4 sm:$0xff]   ;;  %v5595_v14 = vld [vmem:[%s7495_s5 + $0x2a4] ss:$16 sps:$4 sm:$0xff]  }
 0x20f   :  { %3765 = vmatpush1.bf16.msra.mxu0 %v5533_v15  ;;  %3847 = vmatpush1.bf16.msra.mxu1 %v5536_v18  ;;  %v5598_v15 = vld [vmem:[%s7495_s5 + $0x2ac] ss:$16 sps:$4 sm:$0xff]   ;;  %v5593_v18 = vld [vmem:[%s7495_s5 + $0x2a0] ss:$16 sps:$4 sm:$0xff]  }
 0x210   :  { %3766 = vmatprep.subr.bf16.mxu0 %v5541_v19  ;;  %3848 = vmatprep.subr.bf16.mxu1 %v5544_v20  ;;  %v5596_v19 = vld [vmem:[%s7495_s5 + $0x2a8] ss:$16 sps:$4 sm:$0xff]   ;;  %v5601_v20 = vld [vmem:[%s7495_s5 + $0x2c4] ss:$16 sps:$4 sm:$0xff]  }
 0x213   :  { %3767 = vmatpush1.bf16.msra.mxu0 %v5539_v21  ;;  %3849 = vmatpush1.bf16.msra.mxu1 %v5542_v22  ;;  %v5604_v21 = vld [vmem:[%s7495_s5 + $0x2cc] ss:$16 sps:$4 sm:$0xff]   ;;  %v5599_v22 = vld [vmem:[%s7495_s5 + $0x2c0] ss:$16 sps:$4 sm:$0xff]  }
 0x214   :  { %3768 = vmatprep.subr.bf16.mxu0 %v5547_v23  ;;  %3850 = vmatprep.subr.bf16.mxu1 %v5550_v24  ;;  %v5602_v23 = vld [vmem:[%s7495_s5 + $0x2c8] ss:$16 sps:$4 sm:$0xff]   ;;  %v5607_v24 = vld [vmem:[%s7495_s5 + $0x2e4] ss:$16 sps:$4 sm:$0xff]  }
 0x217   :  { %3769 = vmatpush1.bf16.msra.mxu0 %v5545_v25  ;;  %3851 = vmatpush1.bf16.msra.mxu1 %v5548_v26  ;;  %v5610_v25 = vld [vmem:[%s7495_s5 + $0x2ec] ss:$16 sps:$4 sm:$0xff]   ;;  %v5605_v26 = vld [vmem:[%s7495_s5 + $0x2e0] ss:$16 sps:$4 sm:$0xff]  }
 0x218   :  { %3770 = vmatprep.subr.bf16.mxu0 %v5553_v36  ;;  %3852 = vmatprep.subr.bf16.mxu1 %v5556_v27  ;;  %v5608_v36 = vld [vmem:[%s7495_s5 + $0x2e8] ss:$16 sps:$4 sm:$0xff]   ;;  %v5613_v27 = vld [vmem:[%s7495_s5 + $0x304] ss:$16 sps:$4 sm:$0xff]  }
 0x21b   :  { %3771 = vmatpush1.bf16.msra.mxu0 %v5551_v28  ;;  %3853 = vmatpush1.bf16.msra.mxu1 %v5554_v47  ;;  %v5616_v28 = vld [vmem:[%s7495_s5 + $0x30c] ss:$16 sps:$4 sm:$0xff]   ;;  %v5611_v47 = vld [vmem:[%s7495_s5 + $0x300] ss:$16 sps:$4 sm:$0xff]  }
 0x21c   :  { %3772 = vmatprep.subr.bf16.mxu0 %v5559_v51  ;;  %3854 = vmatprep.subr.bf16.mxu1 %v5562_v6  ;;  %v5614_v51 = vld [vmem:[%s7495_s5 + $0x308] ss:$16 sps:$4 sm:$0xff]   ;;  %v5619_v6 = vld [vmem:[%s7495_s5 + $0x324] ss:$16 sps:$4 sm:$0xff]  }
 0x21f   :  { %3773 = vmatpush1.bf16.msra.mxu0 %v5557_v7  ;;  %3855 = vmatpush1.bf16.msra.mxu1 %v5560_v31  ;;  %v5622_v7 = vld [vmem:[%s7495_s5 + $0x32c] ss:$16 sps:$4 sm:$0xff]   ;;  %v5617_v31 = vld [vmem:[%s7495_s5 + $0x320] ss:$16 sps:$4 sm:$0xff]  }
 0x220   :  { %3783 = vmatprep.subr.bf16.mxu0 %v5565_v16  ;;  %3865 = vmatprep.subr.bf16.mxu1 %v5568_v17  ;;  %v5620_v16 = vld [vmem:[%s7495_s5 + $0x328] ss:$16 sps:$4 sm:$0xff]   ;;  %v5625_v17 = vld [vmem:[%s7495_s5 + $0x344] ss:$16 sps:$4 sm:$0xff]  }
 0x2b5   :  { %v2855_v35 = vpop.f32.mrb[16].mxu0  ;;  %v7191_v38 = vpop.f32.mrb[16].mxu1 }
 0x2b6   :  { %v4859_v39 = vadd.f32 %v2855_v35, %v2123_v30  ;;  %v2857_v40 = vpop.f32.mrb[17].mxu0  ;;  %v2939_v41 = vpop.f32.mrb[17].mxu1  ;;  %v5628_v30 = vld [vmem:[%s7495_s5 + $0x34c] ss:$16 sps:$4 sm:$0xff]   ;;  %v5631_v35 = vld [vmem:[%s7495_s5 + $0x364] ss:$16 sps:$4 sm:$0xff]  }
 0x2b7   :  { %v4860_v42 = vadd.f32 %v2857_v40, %v2127_v33  ;;  %v4862_v43 = vadd.f32 %v2939_v41, %v2135_v34  ;;  %v2859_v44 = vpop.f32.mrb[18].mxu0  ;;  %v2941_v45 = vpop.f32.mrb[18].mxu1  ;;  %v5623_v33 = vld [vmem:[%s7495_s5 + $0x340] ss:$16 sps:$4 sm:$0xff]   ;;  %v5626_v34 = vld [vmem:[%s7495_s5 + $0x348] ss:$16 sps:$4 sm:$0xff]  }
 0x2b8   :  { %v2944_v48 = vmax.f32 %v4859_v39, 0.0  ;;  %v2860_v49 = vpop.f32.mrb[19].mxu0  ;;  %v2942_v52 = vpop.f32.mrb[19].mxu1  ;;  %v5634_v39 = vld [vmem:[%s7495_s5 + $0x36c] ss:$16 sps:$4 sm:$0xff]  }
 0x2b9   :  { %v2945_v53 = vmax.f32 %v4860_v42, 0.0  ;;  %v2947_v54 = vmax.f32 %v4862_v43, 0.0  ;;  %v5629_v40 = vld [vmem:[%s7495_s5 + $0x360] ss:$16 sps:$4 sm:$0xff]   ;;  %v5632_v41 = vld [vmem:[%s7495_s5 + $0x368] ss:$16 sps:$4 sm:$0xff]  }
 0x2ba   :  { %v2948_v57 = vpack.c.bf16 %v2944_v48, %v2944_v48  ;;  %v5637_v42 = vld [vmem:[%s7495_s5 + $0x384] ss:$16 sps:$4 sm:$0xff]   ;;  %v5640_v43 = vld [vmem:[%s7495_s5 + $0x38c] ss:$16 sps:$4 sm:$0xff]   ;;  %v5635_v44 = vld [vmem:[%s7495_s5 + $0x380] ss:$16 sps:$4 sm:$0xff]  }
 0x2bb   :  { %v2949_v55 = vpack.c.bf16 %v2945_v53, %v2945_v53  ;;  %v2951_v59 = vpack.c.bf16 %v2947_v54, %v2947_v54  ;;  %v5638_v45 = vld [vmem:[%s7495_s5 + $0x388] ss:$16 sps:$4 sm:$0xff]   ;;  %v5643_v48 = vld [vmem:[%s7495_s5 + $0x3a4] ss:$16 sps:$4 sm:$0xff]   ;;  %v5646_v49 = vld [vmem:[%s7495_s5 + $0x3ac] ss:$16 sps:$4 sm:$0xff]   ;;  %v2131_v54 = vrot.slane %v7183_v29, %v6979_v9 }
 0x2bc   :  { %v5641_v52 = vld [vmem:[%s7495_s5 + $0x3a0] ss:$16 sps:$4 sm:$0xff]   ;;  %v5644_v53 = vld [vmem:[%s7495_s5 + $0x3a8] ss:$16 sps:$4 sm:$0xff]  }
 0x2bd   :  { %3774 = vmatprep.mubr.bf16.mxu0 %v2949_v55  ;;  %3856 = vmatprep.mubr.bf16.mxu1 %v2949_v55  ;;  %v5649_v55 = vld [vmem:[%s7495_s5 + $0x3c4] ss:$16 sps:$4 sm:$0xff]   ;;  %v5650_v29 = vld [vmem:[%s7495_s5 + $0x3c8] ss:$16 sps:$4 sm:$0xff]  }
 0x2be   :  { %3775 = vmatmul.mubr.bf16.vlgmr.msra.gmra.mrb[20].mxu0 %v2948_v57  ;;  %3857 = vmatmul.mubr.bf16.vlgmr.msra.gmra.mrb[20].mxu1 %v2948_v57  ;;  %v4861_v57 = vadd.f32 %v7191_v38, %v2131_v54  ;;  %v5656_v38 = vld [vmem:[%s7495_s5 + $0x3e8] ss:$16 sps:$4 sm:$0xff]  }
 0x2bf   :  { %3784 = vmatpush1.bf16.msra.mxu0 %v5563_v46  ;;  %3866 = vmatpush1.bf16.msra.mxu1 %v5566_v56  ;;  %v5652_v46 = vld [vmem:[%s7495_s5 + $0x3cc] ss:$16 sps:$4 sm:$0xff]   ;;  %v5647_v56 = vld [vmem:[%s7495_s5 + $0x3c0] ss:$16 sps:$4 sm:$0xff]  }
 0x2c0   :  { %3815 = vmatprep.mubr.bf16.mxu0 %v2951_v59  ;;  %3897 = vmatprep.mubr.bf16.mxu1 %v2951_v59  ;;  %v5653_v59 = vld [vmem:[%s7495_s5 + $0x3e0] ss:$16 sps:$4 sm:$0xff]  }
 0x2c1   :  { %3785 = vmatprep.subr.bf16.mxu0 %v5571_v50  ;;  %3867 = vmatprep.subr.bf16.mxu1 %v5574_v58  ;;  %v5655_v50 = vld [vmem:[%s7495_s5 + $0x3e4] ss:$16 sps:$4 sm:$0xff]   ;;  %v5658_v58 = vld [vmem:[%s7495_s5 + $0x3ec] ss:$16 sps:$4 sm:$0xff]  }
 0x2c3   :  { %3786 = vmatpush1.bf16.msra.mxu0 %v5569_v60  ;;  %3868 = vmatpush1.bf16.msra.mxu1 %v5572_v61  ;;  %v2946_v60 = vmax.f32 %v4861_v57, 0.0  ;;  %v5659_v61 = vld [vmem:[%s7496_s7 + $0x40] sm:$0xff]  }
 0x2c4   :  { %3787 = vmatprep.subr.bf16.mxu0 %v5577_v62  ;;  %3869 = vmatprep.subr.bf16.mxu1 %v5580_v63  ;;  %v5660_v62 = vld [vmem:[%s7496_s7 + $0xc0] sm:$0xff]  }
 0x2c5   :  { %v5661_v63 = vld [vmem:[%s7496_s7] sm:$0xff]  }
 0x2c7   :  { %3788 = vmatpush1.bf16.msra.mxu0 %v5575_v0  ;;  %3870 = vmatpush1.bf16.msra.mxu1 %v5578_v1  ;;  %v5662_v0 = vld [vmem:[%s7496_s7 + $0x80] sm:$0xff]   ;;  %v2950_v1 = vpack.c.bf16 %v2946_v60, %v2946_v60 }
 0x2c8   :  { %3789 = vmatprep.subr.bf16.mxu0 %v5583_v2  ;;  %3871 = vmatprep.subr.bf16.mxu1 %v5586_v3  ;;  %v5663_v2 = vld [vmem:[%s7496_s7 + $0x48] sm:$0xff]  }
 0x2c9   :  { %v5664_v3 = vld [vmem:[%s7496_s7 + $0xc8] sm:$0xff]  }
 0x2cb   :  { %3790 = vmatpush1.bf16.msra.mxu0 %v5581_v4  ;;  %3872 = vmatpush1.bf16.msra.mxu1 %v5584_v5  ;;  %v5665_v4 = vld [vmem:[%s7496_s7 + $0x8] sm:$0xff]  }
 0x2cc   :  { %3791 = vmatprep.subr.bf16.mxu0 %v5589_v8  ;;  %3873 = vmatprep.subr.bf16.mxu1 %v5592_v11  ;;  %v5666_v5 = vld [vmem:[%s7496_s7 + $0x88] sm:$0xff]   ;;  %v5667_v8 = vld [vmem:[%s7496_s7 + $0x50] sm:$0xff]  }
 0x2cd   :  { %v5668_v11 = vld [vmem:[%s7496_s7 + $0xd0] sm:$0xff]  }
 0x2cf   :  { %3792 = vmatpush1.bf16.msra.mxu0 %v5587_v12  ;;  %3874 = vmatpush1.bf16.msra.mxu1 %v5590_v13  ;;  %v5669_v12 = vld [vmem:[%s7496_s7 + $0x10] sm:$0xff]  }
 0x2d0   :  { %3793 = vmatprep.subr.bf16.mxu0 %v5595_v14  ;;  %3875 = vmatprep.subr.bf16.mxu1 %v5598_v15  ;;  %v5670_v13 = vld [vmem:[%s7496_s7 + $0x90] sm:$0xff]   ;;  %v5671_v14 = vld [vmem:[%s7496_s7 + $0x58] sm:$0xff]  }
 0x2d1   :  { %v5672_v15 = vld [vmem:[%s7496_s7 + $0xd8] sm:$0xff]  }
 0x2d3   :  { %3794 = vmatpush1.bf16.msra.mxu0 %v5593_v18  ;;  %3876 = vmatpush1.bf16.msra.mxu1 %v5596_v19  ;;  %v5673_v18 = vld [vmem:[%s7496_s7 + $0x18] sm:$0xff]  }
 0x2d4   :  { %3795 = vmatprep.subr.bf16.mxu0 %v5601_v20  ;;  %3877 = vmatprep.subr.bf16.mxu1 %v5604_v21  ;;  %v5674_v19 = vld [vmem:[%s7496_s7 + $0x98] sm:$0xff]   ;;  %v5675_v20 = vld [vmem:[%s7496_s7 + $0x60] sm:$0xff]  }
 0x2d5   :  { %v5676_v21 = vld [vmem:[%s7496_s7 + $0xe0] sm:$0xff]  }
 0x2d7   :  { %3796 = vmatpush1.bf16.msra.mxu0 %v5599_v22  ;;  %3878 = vmatpush1.bf16.msra.mxu1 %v5602_v23  ;;  %v5677_v22 = vld [vmem:[%s7496_s7 + $0x20] sm:$0xff]  }
 0x2d8   :  { %3797 = vmatprep.subr.bf16.mxu0 %v5607_v24  ;;  %3879 = vmatprep.subr.bf16.mxu1 %v5610_v25  ;;  %v5678_v23 = vld [vmem:[%s7496_s7 + $0xa0] sm:$0xff]   ;;  %v5679_v24 = vld [vmem:[%s7496_s7 + $0x68] sm:$0xff]  }
 0x2d9   :  { %v5680_v25 = vld [vmem:[%s7496_s7 + $0xe8] sm:$0xff]  }
 0x2db   :  { %3798 = vmatpush1.bf16.msra.mxu0 %v5605_v26  ;;  %3880 = vmatpush1.bf16.msra.mxu1 %v5608_v36  ;;  %v5681_v26 = vld [vmem:[%s7496_s7 + $0x28] sm:$0xff]  }
 0x2dc   :  { %3799 = vmatprep.subr.bf16.mxu0 %v5613_v27  ;;  %3881 = vmatprep.subr.bf16.mxu1 %v5616_v28  ;;  %v5682_v36 = vld [vmem:[%s7496_s7 + $0xa8] sm:$0xff]   ;;  %v5683_v27 = vld [vmem:[%s7496_s7 + $0x70] sm:$0xff]  }
 0x2dd   :  { %v5684_v28 = vld [vmem:[%s7496_s7 + $0xf0] sm:$0xff]  }
 0x2df   :  { %3800 = vmatpush1.bf16.msra.mxu0 %v5611_v47  ;;  %3882 = vmatpush1.bf16.msra.mxu1 %v5614_v51  ;;  %v5685_v47 = vld [vmem:[%s7496_s7 + $0x30] sm:$0xff]  }
 0x2e0   :  { %3801 = vmatprep.subr.bf16.mxu0 %v5619_v6  ;;  %3883 = vmatprep.subr.bf16.mxu1 %v5622_v7  ;;  %v5686_v51 = vld [vmem:[%s7496_s7 + $0xb0] sm:$0xff]   ;;  %v5687_v6 = vld [vmem:[%s7496_s7 + $0x78] sm:$0xff]  }
 0x2e1   :  { %v5688_v7 = vld [vmem:[%s7496_s7 + $0xf8] sm:$0xff]  }
 0x2e3   :  { %3802 = vmatpush1.bf16.msra.mxu0 %v5617_v31  ;;  %3884 = vmatpush1.bf16.msra.mxu1 %v5620_v16  ;;  %v5689_v31 = vld [vmem:[%s7496_s7 + $0x38] sm:$0xff]  }
 0x2e4   :  { %3803 = vmatprep.subr.bf16.mxu0 %v5625_v17  ;;  %3885 = vmatprep.subr.bf16.mxu1 %v5628_v30  ;;  %v5690_v16 = vld [vmem:[%s7496_s7 + $0xb8] sm:$0xff]   ;;  %v3080_v17 = vld [vmem:[%s7498_s6] sm:$0xf] }
 0x2e5   :  { %v3085_v30 = vrot.slane %v3080_v17, %v6770_v37 }
 0x2e7   :  { %3804 = vmatpush1.bf16.msra.mxu0 %v5623_v33  ;;  %3886 = vmatpush1.bf16.msra.mxu1 %v5626_v34  ;;  %v3093_v33 = vrot.slane %v3080_v17, %v6979_v9  ;;  %v3089_v34 = vrot.slane %v3080_v17, %v6778_v32 }
 0x2e8   :  { %3805 = vmatprep.subr.bf16.mxu0 %v5631_v35  ;;  %3887 = vmatprep.subr.bf16.mxu1 %v5634_v39  ;;  %v3097_v35 = vrot.slane %v3080_v17, %v6982_v10 }
 0x2eb   :  { %3806 = vmatpush1.bf16.msra.mxu0 %v5629_v40  ;;  %3888 = vmatpush1.bf16.msra.mxu1 %v5632_v41 }
 0x2ec   :  { %3807 = vmatprep.subr.bf16.mxu0 %v5637_v42  ;;  %3889 = vmatprep.subr.bf16.mxu1 %v5640_v43 }
 0x2ef   :  { %3808 = vmatpush1.bf16.msra.mxu0 %v5635_v44  ;;  %3890 = vmatpush1.bf16.msra.mxu1 %v5638_v45 }
 0x2f0   :  { %3809 = vmatprep.subr.bf16.mxu0 %v5643_v48  ;;  %3891 = vmatprep.subr.bf16.mxu1 %v5646_v49 }
 0x2f3   :  { %3810 = vmatpush1.bf16.msra.mxu0 %v5641_v52  ;;  %3892 = vmatpush1.bf16.msra.mxu1 %v5644_v53 }
 0x2f4   :  { %3811 = vmatprep.subr.bf16.mxu0 %v5649_v55  ;;  %3893 = vmatprep.subr.bf16.mxu1 %v5652_v46 }
 0x2f7   :  { %3812 = vmatpush1.bf16.msra.mxu0 %v5647_v56  ;;  %3894 = vmatpush1.bf16.msra.mxu1 %v5650_v29 }
 0x2f8   :  { %3813 = vmatprep.subr.bf16.mxu0 %v5655_v50  ;;  %3895 = vmatprep.subr.bf16.mxu1 %v5658_v58  ;;  %v4782_v58 = vld [vmem:[%s7499_s8] ss:$0 sm:$0xff] }
 0x2fb   :  { %3814 = vmatpush1.bf16.msra.mxu0 %v5653_v59  ;;  %3896 = vmatpush1.bf16.msra.mxu1 %v5656_v38 }
 0x2fc   :  { %4815 = vmatprep.subr.bf16.mxu0 %v5659_v61  ;;  %4837 = vmatprep.subr.bf16.mxu1 %v5660_v62 }
 0x2fe   :  { %3816 = vmatmul.mubr.bf16.vlgmr.msra.gmra.mrb[20].mxu0 %v2950_v1  ;;  %3898 = vmatmul.mubr.bf16.vlgmr.msra.gmra.mrb[20].mxu1 %v2950_v1 }
 0x2ff   :  { %4816 = vmatpush3.bf16.msra.mxu0 %v5661_v63  ;;  %4838 = vmatpush3.bf16.msra.mxu1 %v5662_v0 }
 0x300   :  { %4817 = vmatprep.subr.bf16.mxu0 %v5663_v2  ;;  %4839 = vmatprep.subr.bf16.mxu1 %v5664_v3 }
 0x303   :  { %4818 = vmatpush3.bf16.msra.mxu0 %v5665_v4  ;;  %4840 = vmatpush3.bf16.msra.mxu1 %v5666_v5 }
 0x304   :  { %4819 = vmatprep.subr.bf16.mxu0 %v5667_v8  ;;  %4841 = vmatprep.subr.bf16.mxu1 %v5668_v11 }
 0x307   :  { %4820 = vmatpush3.bf16.msra.mxu0 %v5669_v12  ;;  %4842 = vmatpush3.bf16.msra.mxu1 %v5670_v13 }
 0x308   :  { %4821 = vmatprep.subr.bf16.mxu0 %v5671_v14  ;;  %4843 = vmatprep.subr.bf16.mxu1 %v5672_v15 }
 0x30b   :  { %4822 = vmatpush3.bf16.msra.mxu0 %v5673_v18  ;;  %4844 = vmatpush3.bf16.msra.mxu1 %v5674_v19 }
 0x30c   :  { %4823 = vmatprep.subr.bf16.mxu0 %v5675_v20  ;;  %4845 = vmatprep.subr.bf16.mxu1 %v5676_v21 }
 0x30f   :  { %4824 = vmatpush3.bf16.msra.mxu0 %v5677_v22  ;;  %4846 = vmatpush3.bf16.msra.mxu1 %v5678_v23 }
 0x310   :  { %4825 = vmatprep.subr.bf16.mxu0 %v5679_v24  ;;  %4847 = vmatprep.subr.bf16.mxu1 %v5680_v25 }
 0x313   :  { %4826 = vmatpush3.bf16.msra.mxu0 %v5681_v26  ;;  %4848 = vmatpush3.bf16.msra.mxu1 %v5682_v36 }
 0x314   :  { %4827 = vmatprep.subr.bf16.mxu0 %v5683_v27  ;;  %4849 = vmatprep.subr.bf16.mxu1 %v5684_v28 }
 0x317   :  { %4828 = vmatpush3.bf16.msra.mxu0 %v5685_v47  ;;  %4850 = vmatpush3.bf16.msra.mxu1 %v5686_v51 }
 0x318   :  { %4829 = vmatprep.subr.bf16.mxu0 %v5687_v6  ;;  %4851 = vmatprep.subr.bf16.mxu1 %v5688_v7 }
 0x31b   :  { %4830 = vmatpush3.bf16.msra.mxu0 %v5689_v31  ;;  %4852 = vmatpush3.bf16.msra.mxu1 %v5690_v16 }
 0x3d1   :  { %v3817_v39 = vpop.f32.mrb[20].mxu0  ;;  %v3899_v40 = vpop.f32.mrb[20].mxu1 }
 0x3d2   :  { %v4863_v41 = vadd.f32 %v3817_v39, %v3085_v30  ;;  %v4865_v42 = vadd.f32 %v3899_v40, %v3093_v33  ;;  %v3819_v43 = vpop.f32.mrb[21].mxu0  ;;  %v3901_v44 = vpop.f32.mrb[21].mxu1 }
 0x3d3   :  { %v4864_v45 = vadd.f32 %v3819_v43, %v3089_v34  ;;  %v4866_v48 = vadd.f32 %v3901_v44, %v3097_v35  ;;  %v3821_v49 = vpop.f32.mrb[22].mxu0  ;;  %v3903_v52 = vpop.f32.mrb[22].mxu1 }
 0x3d4   :  { %v3906_v53 = vmax.f32 %v4863_v41, 0.0  ;;  %v3908_v54 = vmax.f32 %v4865_v42, 0.0  ;;  %v3822_v55 = vpop.f32.mrb[23].mxu0  ;;  %v3904_v37 = vpop.f32.mrb[23].mxu1 }
 0x3d5   :  { %v3907_v46 = vmax.f32 %v4864_v45, 0.0  ;;  %v3909_v9 = vmax.f32 %v4866_v48, 0.0 }
 0x3d6   :  { %v3910_v29 = vpack.c.bf16 %v3906_v53, %v3906_v53  ;;  %v3912_v10 = vpack.c.bf16 %v3908_v54, %v3908_v54 }
 0x3d7   :  { %v3911_v56 = vpack.c.bf16 %v3907_v46, %v3907_v46  ;;  %v3913_v32 = vpack.c.bf16 %v3909_v9, %v3909_v9 }
 0x3d9   :  { %4209 = vmatprep.mubr.bf16.mxu0 %v3911_v56  ;;  %4249 = vmatprep.mubr.bf16.mxu1 %v3913_v32 }
 0x3da   :  { %4210 = vmatmul.mubr.bf16.vlgmr.msra.gmra.mrb[24].mxu0 %v3910_v29  ;;  %4250 = vmatmul.mubr.bf16.vlgmr.msra.gmra.mrb[24].mxu1 %v3912_v10 }
 0x4ad   :  { %v4831_v57 = vpop.f32.mrb[24].mxu0  ;;  %v4853_v50 = vpop.f32.mrb[24].mxu1 }
 0x4ae   :  { %v4832_v59 = vpop.f32.mrb[25].mxu0  ;;  %v4854_v38 = vpop.f32.mrb[25].mxu1 }
 0x4af   :  { %v4833_v60 = vadd.f32 %v4832_v59, %v4831_v57  ;;  %v4855_v61 = vadd.f32 %v4854_v38, %v4853_v50  ;;  %v4834_v62 = vpop.f32.mrb[26].mxu0  ;;  %v4856_v63 = vpop.f32.mrb[26].mxu1 }
 0x4b0   :  { %v4835_v0 = vpop.f32.mrb[27].mxu0  ;;  %v4857_v1 = vpop.f32.mrb[27].mxu1 }
 0x4b1   :  { %v4212_v2 = vadd.f32 %v4833_v60, %v4782_v58 }
 0x4b3   :  { %v4252_v3 = vadd.f32 %v4855_v61, %v4212_v2 }
 0x4b5   :  { %4257 = vst [vmem:[%s7500_s9] sm:$0xff] %v4252_v3 }

</bundles_post_ra>
